<compile_context>
chip_gen: v6e
topology: v6e:2x2x1
jax: 0.10.0
libtpu: 0.0.40
codegen_flags: <defaults>
</compile_context>

<pallas_src>
from functools import partial

import jax
import jax.numpy as jnp
from jax import lax
from jax.experimental import pallas as pl
from jax.experimental.pallas import tpu as pltpu

BN_EPS = 1e-5


def _conv3x3_same(act_bf16, w_ref, H, W, Ci, Co):
    """3x3 / stride 1 / pad 1 conv of one (H, W, Ci) image.

    act_bf16 : (H, W, Ci) bfloat16
    w_ref    : (3, 3*Ci, Co) bfloat16, index (dy, dx*Ci + ci, co)
    returns  : (H*W, Co) float32
    """
    zc = jnp.zeros((H, 1, Ci), jnp.bfloat16)
    actw = jnp.concatenate([zc, act_bf16, zc], axis=1)        # (H, W+2, Ci)
    zr = jnp.zeros((1, W + 2, Ci), jnp.bfloat16)
    actp = jnp.concatenate([zr, actw, zr], axis=0)            # (H+2, W+2, Ci)

    acc = jnp.zeros((H * W, Co), jnp.float32)
    for dy in range(3):                                       # unrolled (3 taps)
        rows = actp[dy:dy + H]                                # (H, W+2, Ci)
        # merge the 3 dx taps into one K = 3*Ci contraction
        patch = jnp.concatenate(
            [rows[:, 0:W, :], rows[:, 1:W + 1, :], rows[:, 2:W + 2, :]],
            axis=-1).reshape(H * W, 3 * Ci)
        acc = acc + jnp.dot(patch, w_ref[dy],
                            preferred_element_type=jnp.float32)
    return acc


def basic_block_preact_kernel(x_ref, s1_ref, b1_ref, w1_ref, s2_ref, b2_ref,
                              w2_ref, wd_ref, o_ref, *, has_downsample):
    # Per grid step: one image.
    #   x_ref : (1, H, W, Cin)     f32 activations
    #   s1/b1 : (1, Cin)           folded bn1 scale / shift (f32)
    #   w1    : (3, 3*Cin, Cout)   conv1 weights, dx-merged, bf16
    #   s2/b2 : (1, Cout)          folded bn2 scale / shift (f32)
    #   w2    : (3, 3*Cout, Cout)  conv2 weights, dx-merged, bf16
    #   wd    : (Cin, Cout)        1x1 downsample weights, bf16
    #   o_ref : (1, H*W, Cout)     f32 output
    _, H, W, Cin = x_ref.shape
    Cout = o_ref.shape[-1]

    x = x_ref[0]                                          # (H, W, Cin) f32

    # ---- bn1 (folded inference affine) + relu --------------------------------
    s1 = s1_ref[...].reshape(1, 1, Cin)
    b1 = b1_ref[...].reshape(1, 1, Cin)
    act1 = jnp.maximum(x * s1 + b1, 0.0)
    act1_bf = act1.astype(jnp.bfloat16)

    # ---- conv1: 3x3, stride 1, pad 1 (bf16 MXU inputs, f32 accumulation) -----
    # TODO(synk): only stride=1 is implemented (module also allows stride>1).
    acc1 = _conv3x3_same(act1_bf, w1_ref, H, W, Cin, Cout)    # (H*W, Cout) f32

    # ---- bn2 + relu; dropout(p=0.1) is identity in eval mode -----------------
    # TODO(synk): training-mode dropout RNG is not replicated (eval identity).
    r1 = jnp.maximum(acc1 * s2_ref[...] + b2_ref[...], 0.0)

    # ---- conv2: 3x3, stride 1, pad 1 ------------------------------------------
    r1_bf = r1.reshape(H, W, Cout).astype(jnp.bfloat16)
    acc2 = _conv3x3_same(r1_bf, w2_ref, H, W, Cout, Cout)     # (H*W, Cout) f32

    # ---- shortcut --------------------------------------------------------------
    if has_downsample:
        shortcut = jnp.dot(act1_bf.reshape(H * W, Cin), wd_ref[...],
                           preferred_element_type=jnp.float32)
    else:
        shortcut = x.reshape(H * W, Cout)   # Cin == Cout guaranteed here

    # TODO(synk): for small Cout (<128) stores use only Cout/128 lanes; pad the
    # channel axis (or fold W into lanes) for lane-dense stores. Real ResNet
    # stages with Cout >= 128 are already lane-dense.
    o_ref[...] = (shortcut + acc2).reshape(1, H * W, Cout)


def prepare_params(p):
    """One-time parameter preparation (outside the per-call hot path): fold BN
    running stats into affine scale/shift and re-layout conv weights into the
    dx-merged (3, 3*Cin, Cout) bf16 form consumed by the kernel."""
    Cin, Cout = p["w1"].shape[2], p["w1"].shape[3]
    s1 = p["gamma1"] / jnp.sqrt(p["var1"] + BN_EPS)
    b1 = p["beta1"] - p["mean1"] * s1
    s2 = p["gamma2"] / jnp.sqrt(p["var2"] + BN_EPS)
    b2 = p["beta2"] - p["mean2"] * s2
    return {
        "s1": s1.reshape(1, Cin).astype(jnp.float32),
        "b1": b1.reshape(1, Cin).astype(jnp.float32),
        "s2": s2.reshape(1, Cout).astype(jnp.float32),
        "b2": b2.reshape(1, Cout).astype(jnp.float32),
        "w1": p["w1"].reshape(3, 3 * Cin, Cout).astype(jnp.bfloat16),
        "w2": p["w2"].reshape(3, 3 * Cout, Cout).astype(jnp.bfloat16),
        "wd": p["wd"].astype(jnp.bfloat16),
        "Cin": Cin,
        "Cout": Cout,
    }


def basic_block_preact_nhwc(x_nhwc, q):
    """NHWC float32 in -> NHWC float32 out. `q` is the prepare_params() dict."""
    N, H, W, Cin = x_nhwc.shape
    Cout = q["Cout"]
    assert Cin == q["Cin"]
    has_downsample = Cin != Cout          # stride == 1 in this kernel

    kernel = partial(basic_block_preact_kernel, has_downsample=has_downsample)

    in_specs = [
        pl.BlockSpec((1, H, W, Cin), lambda n: (n, 0, 0, 0)),      # x tile
        pl.BlockSpec((1, Cin), lambda n: (0, 0)),                  # s1
        pl.BlockSpec((1, Cin), lambda n: (0, 0)),                  # b1
        pl.BlockSpec((3, 3 * Cin, Cout), lambda n: (0, 0, 0)),     # w1 (merged)
        pl.BlockSpec((1, Cout), lambda n: (0, 0)),                 # s2
        pl.BlockSpec((1, Cout), lambda n: (0, 0)),                 # b2
        pl.BlockSpec((3, 3 * Cout, Cout), lambda n: (0, 0, 0)),    # w2 (merged)
        pl.BlockSpec((Cin, Cout), lambda n: (0, 0)),               # wd (1x1)
    ]
    out_specs = pl.BlockSpec((1, H * W, Cout), lambda n: (n, 0, 0))

    # Advisory cost estimate for XLA's scheduler.
    flops = 2 * N * H * W * (9 * Cin * Cout + 9 * Cout * Cout
                             + (Cin * Cout if has_downsample else 0))
    bytes_accessed = (N * H * W * Cin * 4 + N * H * W * Cout * 4
                      + (q["w1"].size + q["w2"].size + q["wd"].size) * 2
                      + (2 * Cin + 2 * Cout) * 4)
    cost = pl.CostEstimate(flops=flops, transcendentals=0,
                           bytes_accessed=bytes_accessed)

    # Explicit VMEM budget: double-buffered in/out tiles + resident weights
    # + allowance for in-kernel intermediates (padded windows, merged patches,
    # f32 accumulators).  Per-image tiles keep this far below v7x's 64 MiB.
    f32b, bf16b = 4, 2
    in_tile = H * W * Cin * f32b
    out_tile = H * W * Cout * f32b
    weights = ((q["w1"].size + q["w2"].size + q["wd"].size) * bf16b
               + (2 * Cin + 2 * Cout) * f32b)
    inter = ((H + 2) * (W + 2) * (Cin + Cout) * bf16b
             + H * W * 3 * (Cin + Cout) * bf16b
             + 4 * H * W * Cout * f32b)
    vmem_limit = int(min(64 * 2 ** 20,
                         max(8 * 2 ** 20,
                             2 * (in_tile + out_tile) + weights + 4 * inter)))

    out = pl.pallas_call(
        kernel,
        out_shape=jax.ShapeDtypeStruct((N, H * W, Cout), jnp.float32),
        grid=(N,),
        in_specs=in_specs,
        out_specs=out_specs,
        compiler_params=pltpu.CompilerParams(
            dimension_semantics=("parallel",),
            vmem_limit_bytes=vmem_limit,
        ),
        cost_estimate=cost,
    )(x_nhwc.astype(jnp.float32), q["s1"], q["b1"], q["w1"],
      q["s2"], q["b2"], q["w2"], q["wd"])

    return out.reshape(N, H, W, Cout)


def basic_block_preact(x_nchw, q):
    """PyTorch-layout wrapper: NCHW in / NCHW out.  In a full network keep
    activations NHWC across blocks and call basic_block_preact_nhwc directly
    (these per-call transposes are the overhead the review flags)."""
    x = jnp.transpose(x_nchw, (0, 2, 3, 1))
    out = basic_block_preact_nhwc(x, q)
    return jnp.transpose(out, (0, 3, 1, 2))


def make_params(key, in_chan, out_chan):
    """Deterministic synthetic parameters matching the module's shapes.
    Conv weights use kaiming_normal(fan_out, gain=sqrt(2)) statistics, stored
    in HWIO layout."""
    ks = jax.random.split(key, 11)
    std_c = (2.0 / (out_chan * 3 * 3)) ** 0.5
    std_d = (2.0 / (out_chan * 1 * 1)) ** 0.5
    return {
        "w1": std_c * jax.random.normal(ks[0], (3, 3, in_chan, out_chan), jnp.float32),
        "w2": std_c * jax.random.normal(ks[1], (3, 3, out_chan, out_chan), jnp.float32),
        "wd": std_d * jax.random.normal(ks[2], (in_chan, out_chan), jnp.float32),
        "gamma1": 1.0 + 0.1 * jax.random.normal(ks[3], (in_chan,), jnp.float32),
        "beta1": 0.1 * jax.random.normal(ks[4], (in_chan,), jnp.float32),
        "mean1": 0.1 * jax.random.normal(ks[5], (in_chan,), jnp.float32),
        "var1": 1.0 + 0.5 * jax.random.uniform(ks[6], (in_chan,), jnp.float32),
        "gamma2": 1.0 + 0.1 * jax.random.normal(ks[7], (out_chan,), jnp.float32),
        "beta2": 0.1 * jax.random.normal(ks[8], (out_chan,), jnp.float32),
        "mean2": 0.1 * jax.random.normal(ks[9], (out_chan,), jnp.float32),
        "var2": 1.0 + 0.5 * jax.random.uniform(ks[10], (out_chan,), jnp.float32),
    }


def ref_forward(x_nchw, p):
    """Pure-JAX reference of the PyTorch forward (eval mode)."""
    x = jnp.transpose(x_nchw, (0, 2, 3, 1))
    dn = ("NHWC", "HWIO", "NHWC")
    bn1 = (x - p["mean1"]) / jnp.sqrt(p["var1"] + BN_EPS) * p["gamma1"] + p["beta1"]
    act1 = jnp.maximum(bn1, 0.0)
    r = lax.conv_general_dilated(act1, p["w1"], (1, 1), "SAME", dimension_numbers=dn)
    r = (r - p["mean2"]) / jnp.sqrt(p["var2"] + BN_EPS) * p["gamma2"] + p["beta2"]
    r = jnp.maximum(r, 0.0)
    r = lax.conv_general_dilated(r, p["w2"], (1, 1), "SAME", dimension_numbers=dn)
    sc = lax.conv_general_dilated(act1, p["wd"][None, None], (1, 1), "SAME",
                                  dimension_numbers=dn)
    return jnp.transpose(sc + r, (0, 3, 1, 2))


if __name__ == "__main__":
    key = jax.random.PRNGKey(0)
    kx, kp = jax.random.split(key)

    N, Cin, H, W = 2, 4, 16, 16
    Cout = 8  # in_chan != out_chan -> downsample branch exercised

    x = jax.random.normal(kx, (N, Cin, H, W), jnp.float32)
    params = make_params(kp, Cin, Cout)
    q = prepare_params(params)        # one-time: BN fold + weight re-layout

    out = basic_block_preact(x, q)
    out = jax.block_until_ready(out)
    assert out.shape == (N, Cout, H, W)

    ref = ref_forward(x, params)
    max_err = float(jnp.max(jnp.abs(out - ref)))
    # bf16 MXU inputs with f32 accumulation -> mixed abs/rel tolerance.
    assert bool(jnp.allclose(out, ref, atol=5e-2, rtol=5e-2)), \
        f"mismatch vs reference: max abs err {max_err}"

    print("KERNEL_OK")
</pallas_src>

<mosaic_0001>
module attributes {stable_mosaic.version = 11 : i64} {
  func.func @basic_block_preact_kernel(%arg0: i32, %arg1: memref<1x16x16x4xf32, #tpu.memory_space<vmem>>, %arg2: memref<1x4xf32, #tpu.memory_space<vmem>>, %arg3: memref<1x4xf32, #tpu.memory_space<vmem>>, %arg4: memref<3x12x8xbf16, #tpu.memory_space<vmem>>, %arg5: memref<1x8xf32, #tpu.memory_space<vmem>>, %arg6: memref<1x8xf32, #tpu.memory_space<vmem>>, %arg7: memref<3x24x8xbf16, #tpu.memory_space<vmem>>, %arg8: memref<4x8xbf16, #tpu.memory_space<vmem>>, %arg9: memref<1x256x8xf32, #tpu.memory_space<vmem>>) attributes {dimension_semantics = [#tpu.dimension_semantics<parallel>], iteration_bounds = array<i64: 2>, scalar_prefetch = 0 : i64, scratch_operands = 0 : i64, tpu.core_type = #tpu.core_type<tc>, window_params = [{transform_indices = @transform_0, window_bounds = array<i64: 1, 16, 16, 4>}, {pipeline_mode = #tpu.pipeline_mode<synchronous>, transform_indices = @transform_1, window_bounds = array<i64: 1, 4>}, {pipeline_mode = #tpu.pipeline_mode<synchronous>, transform_indices = @transform_2, window_bounds = array<i64: 1, 4>}, {pipeline_mode = #tpu.pipeline_mode<synchronous>, transform_indices = @transform_3, window_bounds = array<i64: 3, 12, 8>}, {pipeline_mode = #tpu.pipeline_mode<synchronous>, transform_indices = @transform_4, window_bounds = array<i64: 1, 8>}, {pipeline_mode = #tpu.pipeline_mode<synchronous>, transform_indices = @transform_5, window_bounds = array<i64: 1, 8>}, {pipeline_mode = #tpu.pipeline_mode<synchronous>, transform_indices = @transform_6, window_bounds = array<i64: 3, 24, 8>}, {pipeline_mode = #tpu.pipeline_mode<synchronous>, transform_indices = @transform_7, window_bounds = array<i64: 4, 8>}, {transform_indices = @transform_8, window_bounds = array<i64: 1, 256, 8>}]} {
    %c0 = arith.constant 0 : index
    %c0_0 = arith.constant 0 : index
    %c0_1 = arith.constant 0 : index
    %c0_2 = arith.constant 0 : index
    %0 = vector.load %arg1[%c0, %c0_0, %c0_1, %c0_2] : memref<1x16x16x4xf32, #tpu.memory_space<vmem>>, vector<1x16x16x4xf32>
    %1 = vector.shape_cast %0 : vector<1x16x16x4xf32> to vector<16x16x4xf32>
    %c0_3 = arith.constant 0 : index
    %c0_4 = arith.constant 0 : index
    %2 = vector.load %arg2[%c0_3, %c0_4] : memref<1x4xf32, #tpu.memory_space<vmem>>, vector<1x4xf32>
    %3 = vector.shape_cast %2 : vector<1x4xf32> to vector<1x1x4xf32>
    %c0_5 = arith.constant 0 : index
    %c0_6 = arith.constant 0 : index
    %4 = vector.load %arg3[%c0_5, %c0_6] : memref<1x4xf32, #tpu.memory_space<vmem>>, vector<1x4xf32>
    %5 = vector.shape_cast %4 : vector<1x4xf32> to vector<1x1x4xf32>
    %6 = vector.broadcast %3 : vector<1x1x4xf32> to vector<16x16x4xf32>
    %7 = arith.mulf %1, %6 : vector<16x16x4xf32>
    %8 = vector.broadcast %5 : vector<1x1x4xf32> to vector<16x16x4xf32>
    %9 = arith.addf %7, %8 : vector<16x16x4xf32>
    %cst = arith.constant 0.000000e+00 : f32
    %10 = vector.broadcast %cst : f32 to vector<16x16x4xf32>
    %11 = arith.maximumf %9, %10 : vector<16x16x4xf32>
    %12 = arith.truncf %11 : vector<16x16x4xf32> to vector<16x16x4xbf16>
    %cst_7 = arith.constant 0.000000e+00 : bf16
    %13 = vector.broadcast %cst_7 : bf16 to vector<16x1x4xbf16>
    %14 = tpu.concatenate %13, %12, %13 in 1 : vector<16x1x4xbf16>, vector<16x16x4xbf16>, vector<16x1x4xbf16> -> vector<16x18x4xbf16>
    %cst_8 = arith.constant 0.000000e+00 : bf16
    %15 = vector.broadcast %cst_8 : bf16 to vector<1x18x4xbf16>
    %16 = tpu.concatenate %15, %14, %15 in 0 : vector<1x18x4xbf16>, vector<16x18x4xbf16>, vector<1x18x4xbf16> -> vector<18x18x4xbf16>
    %cst_9 = arith.constant 0.000000e+00 : f32
    %17 = vector.broadcast %cst_9 : f32 to vector<256x8xf32>
    %18 = vector.extract_strided_slice %16 {offsets = [0, 0, 0], sizes = [16, 18, 4], strides = [1, 1, 1]} : vector<18x18x4xbf16> to vector<16x18x4xbf16>
    %19 = vector.extract_strided_slice %18 {offsets = [0, 0, 0], sizes = [16, 16, 4], strides = [1, 1, 1]} : vector<16x18x4xbf16> to vector<16x16x4xbf16>
    %20 = vector.extract_strided_slice %18 {offsets = [0, 1, 0], sizes = [16, 16, 4], strides = [1, 1, 1]} : vector<16x18x4xbf16> to vector<16x16x4xbf16>
    %21 = vector.extract_strided_slice %18 {offsets = [0, 2, 0], sizes = [16, 16, 4], strides = [1, 1, 1]} : vector<16x18x4xbf16> to vector<16x16x4xbf16>
    %22 = tpu.concatenate %19, %20, %21 in 2 : vector<16x16x4xbf16>, vector<16x16x4xbf16>, vector<16x16x4xbf16> -> vector<16x16x12xbf16>
    %23 = vector.shape_cast %22 : vector<16x16x12xbf16> to vector<256x12xbf16>
    %c0_10 = arith.constant 0 : index
    %c0_11 = arith.constant 0 : index
    %c0_12 = arith.constant 0 : index
    %24 = vector.load %arg4[%c0_10, %c0_11, %c0_12] : memref<3x12x8xbf16, #tpu.memory_space<vmem>>, vector<1x12x8xbf16>
    %25 = vector.shape_cast %24 : vector<1x12x8xbf16> to vector<12x8xbf16>
    %cst_13 = arith.constant dense<0.000000e+00> : vector<256x8xf32>
    %26 = tpu.matmul %23, %25, %cst_13 {dimension_numbers = #tpu.dot_dimension_numbers<[1], [0], [0], [1], [0, 0, 1, 1], [], []>} : vector<256x12xbf16>, vector<12x8xbf16>, vector<256x8xf32> -> vector<256x8xf32>
    %27 = arith.addf %17, %26 : vector<256x8xf32>
    %28 = vector.extract_strided_slice %16 {offsets = [1, 0, 0], sizes = [16, 18, 4], strides = [1, 1, 1]} : vector<18x18x4xbf16> to vector<16x18x4xbf16>
    %29 = vector.extract_strided_slice %28 {offsets = [0, 0, 0], sizes = [16, 16, 4], strides = [1, 1, 1]} : vector<16x18x4xbf16> to vector<16x16x4xbf16>
    %30 = vector.extract_strided_slice %28 {offsets = [0, 1, 0], sizes = [16, 16, 4], strides = [1, 1, 1]} : vector<16x18x4xbf16> to vector<16x16x4xbf16>
    %31 = vector.extract_strided_slice %28 {offsets = [0, 2, 0], sizes = [16, 16, 4], strides = [1, 1, 1]} : vector<16x18x4xbf16> to vector<16x16x4xbf16>
    %32 = tpu.concatenate %29, %30, %31 in 2 : vector<16x16x4xbf16>, vector<16x16x4xbf16>, vector<16x16x4xbf16> -> vector<16x16x12xbf16>
    %33 = vector.shape_cast %32 : vector<16x16x12xbf16> to vector<256x12xbf16>
    %c1 = arith.constant 1 : index
    %c0_14 = arith.constant 0 : index
    %c0_15 = arith.constant 0 : index
    %34 = vector.load %arg4[%c1, %c0_14, %c0_15] : memref<3x12x8xbf16, #tpu.memory_space<vmem>>, vector<1x12x8xbf16>
    %35 = vector.shape_cast %34 : vector<1x12x8xbf16> to vector<12x8xbf16>
    %cst_16 = arith.constant dense<0.000000e+00> : vector<256x8xf32>
    %36 = tpu.matmul %33, %35, %cst_16 {dimension_numbers = #tpu.dot_dimension_numbers<[1], [0], [0], [1], [0, 0, 1, 1], [], []>} : vector<256x12xbf16>, vector<12x8xbf16>, vector<256x8xf32> -> vector<256x8xf32>
    %37 = arith.addf %27, %36 : vector<256x8xf32>
    %38 = vector.extract_strided_slice %16 {offsets = [2, 0, 0], sizes = [16, 18, 4], strides = [1, 1, 1]} : vector<18x18x4xbf16> to vector<16x18x4xbf16>
    %39 = vector.extract_strided_slice %38 {offsets = [0, 0, 0], sizes = [16, 16, 4], strides = [1, 1, 1]} : vector<16x18x4xbf16> to vector<16x16x4xbf16>
    %40 = vector.extract_strided_slice %38 {offsets = [0, 1, 0], sizes = [16, 16, 4], strides = [1, 1, 1]} : vector<16x18x4xbf16> to vector<16x16x4xbf16>
    %41 = vector.extract_strided_slice %38 {offsets = [0, 2, 0], sizes = [16, 16, 4], strides = [1, 1, 1]} : vector<16x18x4xbf16> to vector<16x16x4xbf16>
    %42 = tpu.concatenate %39, %40, %41 in 2 : vector<16x16x4xbf16>, vector<16x16x4xbf16>, vector<16x16x4xbf16> -> vector<16x16x12xbf16>
    %43 = vector.shape_cast %42 : vector<16x16x12xbf16> to vector<256x12xbf16>
    %c2 = arith.constant 2 : index
    %c0_17 = arith.constant 0 : index
    %c0_18 = arith.constant 0 : index
    %44 = vector.load %arg4[%c2, %c0_17, %c0_18] : memref<3x12x8xbf16, #tpu.memory_space<vmem>>, vector<1x12x8xbf16>
    %45 = vector.shape_cast %44 : vector<1x12x8xbf16> to vector<12x8xbf16>
    %cst_19 = arith.constant dense<0.000000e+00> : vector<256x8xf32>
    %46 = tpu.matmul %43, %45, %cst_19 {dimension_numbers = #tpu.dot_dimension_numbers<[1], [0], [0], [1], [0, 0, 1, 1], [], []>} : vector<256x12xbf16>, vector<12x8xbf16>, vector<256x8xf32> -> vector<256x8xf32>
    %47 = arith.addf %37, %46 : vector<256x8xf32>
    %c0_20 = arith.constant 0 : index
    %c0_21 = arith.constant 0 : index
    %48 = vector.load %arg5[%c0_20, %c0_21] : memref<1x8xf32, #tpu.memory_space<vmem>>, vector<1x8xf32>
    %49 = vector.broadcast %48 : vector<1x8xf32> to vector<256x8xf32>
    %50 = arith.mulf %47, %49 : vector<256x8xf32>
    %c0_22 = arith.constant 0 : index
    %c0_23 = arith.constant 0 : index
    %51 = vector.load %arg6[%c0_22, %c0_23] : memref<1x8xf32, #tpu.memory_space<vmem>>, vector<1x8xf32>
    %52 = vector.broadcast %51 : vector<1x8xf32> to vector<256x8xf32>
    %53 = arith.addf %50, %52 : vector<256x8xf32>
    %cst_24 = arith.constant 0.000000e+00 : f32
    %54 = vector.broadcast %cst_24 : f32 to vector<256x8xf32>
    %55 = arith.maximumf %53, %54 : vector<256x8xf32>
    %56 = vector.shape_cast %55 : vector<256x8xf32> to vector<16x16x8xf32>
    %57 = arith.truncf %56 : vector<16x16x8xf32> to vector<16x16x8xbf16>
    %cst_25 = arith.constant 0.000000e+00 : bf16
    %58 = vector.broadcast %cst_25 : bf16 to vector<16x1x8xbf16>
    %59 = tpu.concatenate %58, %57, %58 in 1 : vector<16x1x8xbf16>, vector<16x16x8xbf16>, vector<16x1x8xbf16> -> vector<16x18x8xbf16>
    %cst_26 = arith.constant 0.000000e+00 : bf16
    %60 = vector.broadcast %cst_26 : bf16 to vector<1x18x8xbf16>
    %61 = tpu.concatenate %60, %59, %60 in 0 : vector<1x18x8xbf16>, vector<16x18x8xbf16>, vector<1x18x8xbf16> -> vector<18x18x8xbf16>
    %cst_27 = arith.constant 0.000000e+00 : f32
    %62 = vector.broadcast %cst_27 : f32 to vector<256x8xf32>
    %63 = vector.extract_strided_slice %61 {offsets = [0, 0, 0], sizes = [16, 18, 8], strides = [1, 1, 1]} : vector<18x18x8xbf16> to vector<16x18x8xbf16>
    %64 = vector.extract_strided_slice %63 {offsets = [0, 0, 0], sizes = [16, 16, 8], strides = [1, 1, 1]} : vector<16x18x8xbf16> to vector<16x16x8xbf16>
    %65 = vector.extract_strided_slice %63 {offsets = [0, 1, 0], sizes = [16, 16, 8], strides = [1, 1, 1]} : vector<16x18x8xbf16> to vector<16x16x8xbf16>
    %66 = vector.extract_strided_slice %63 {offsets = [0, 2, 0], sizes = [16, 16, 8], strides = [1, 1, 1]} : vector<16x18x8xbf16> to vector<16x16x8xbf16>
    %67 = tpu.concatenate %64, %65, %66 in 2 : vector<16x16x8xbf16>, vector<16x16x8xbf16>, vector<16x16x8xbf16> -> vector<16x16x24xbf16>
    %68 = vector.shape_cast %67 : vector<16x16x24xbf16> to vector<256x24xbf16>
    %c0_28 = arith.constant 0 : index
    %c0_29 = arith.constant 0 : index
    %c0_30 = arith.constant 0 : index
    %69 = vector.load %arg7[%c0_28, %c0_29, %c0_30] : memref<3x24x8xbf16, #tpu.memory_space<vmem>>, vector<1x24x8xbf16>
    %70 = vector.shape_cast %69 : vector<1x24x8xbf16> to vector<24x8xbf16>
    %cst_31 = arith.constant dense<0.000000e+00> : vector<256x8xf32>
    %71 = tpu.matmul %68, %70, %cst_31 {dimension_numbers = #tpu.dot_dimension_numbers<[1], [0], [0], [1], [0, 0, 1, 1], [], []>} : vector<256x24xbf16>, vector<24x8xbf16>, vector<256x8xf32> -> vector<256x8xf32>
    %72 = arith.addf %62, %71 : vector<256x8xf32>
    %73 = vector.extract_strided_slice %61 {offsets = [1, 0, 0], sizes = [16, 18, 8], strides = [1, 1, 1]} : vector<18x18x8xbf16> to vector<16x18x8xbf16>
    %74 = vector.extract_strided_slice %73 {offsets = [0, 0, 0], sizes = [16, 16, 8], strides = [1, 1, 1]} : vector<16x18x8xbf16> to vector<16x16x8xbf16>
    %75 = vector.extract_strided_slice %73 {offsets = [0, 1, 0], sizes = [16, 16, 8], strides = [1, 1, 1]} : vector<16x18x8xbf16> to vector<16x16x8xbf16>
    %76 = vector.extract_strided_slice %73 {offsets = [0, 2, 0], sizes = [16, 16, 8], strides = [1, 1, 1]} : vector<16x18x8xbf16> to vector<16x16x8xbf16>
    %77 = tpu.concatenate %74, %75, %76 in 2 : vector<16x16x8xbf16>, vector<16x16x8xbf16>, vector<16x16x8xbf16> -> vector<16x16x24xbf16>
    %78 = vector.shape_cast %77 : vector<16x16x24xbf16> to vector<256x24xbf16>
    %c1_32 = arith.constant 1 : index
    %c0_33 = arith.constant 0 : index
    %c0_34 = arith.constant 0 : index
    %79 = vector.load %arg7[%c1_32, %c0_33, %c0_34] : memref<3x24x8xbf16, #tpu.memory_space<vmem>>, vector<1x24x8xbf16>
    %80 = vector.shape_cast %79 : vector<1x24x8xbf16> to vector<24x8xbf16>
    %cst_35 = arith.constant dense<0.000000e+00> : vector<256x8xf32>
    %81 = tpu.matmul %78, %80, %cst_35 {dimension_numbers = #tpu.dot_dimension_numbers<[1], [0], [0], [1], [0, 0, 1, 1], [], []>} : vector<256x24xbf16>, vector<24x8xbf16>, vector<256x8xf32> -> vector<256x8xf32>
    %82 = arith.addf %72, %81 : vector<256x8xf32>
    %83 = vector.extract_strided_slice %61 {offsets = [2, 0, 0], sizes = [16, 18, 8], strides = [1, 1, 1]} : vector<18x18x8xbf16> to vector<16x18x8xbf16>
    %84 = vector.extract_strided_slice %83 {offsets = [0, 0, 0], sizes = [16, 16, 8], strides = [1, 1, 1]} : vector<16x18x8xbf16> to vector<16x16x8xbf16>
    %85 = vector.extract_strided_slice %83 {offsets = [0, 1, 0], sizes = [16, 16, 8], strides = [1, 1, 1]} : vector<16x18x8xbf16> to vector<16x16x8xbf16>
    %86 = vector.extract_strided_slice %83 {offsets = [0, 2, 0], sizes = [16, 16, 8], strides = [1, 1, 1]} : vector<16x18x8xbf16> to vector<16x16x8xbf16>
    %87 = tpu.concatenate %84, %85, %86 in 2 : vector<16x16x8xbf16>, vector<16x16x8xbf16>, vector<16x16x8xbf16> -> vector<16x16x24xbf16>
    %88 = vector.shape_cast %87 : vector<16x16x24xbf16> to vector<256x24xbf16>
    %c2_36 = arith.constant 2 : index
    %c0_37 = arith.constant 0 : index
    %c0_38 = arith.constant 0 : index
    %89 = vector.load %arg7[%c2_36, %c0_37, %c0_38] : memref<3x24x8xbf16, #tpu.memory_space<vmem>>, vector<1x24x8xbf16>
    %90 = vector.shape_cast %89 : vector<1x24x8xbf16> to vector<24x8xbf16>
    %cst_39 = arith.constant dense<0.000000e+00> : vector<256x8xf32>
    %91 = tpu.matmul %88, %90, %cst_39 {dimension_numbers = #tpu.dot_dimension_numbers<[1], [0], [0], [1], [0, 0, 1, 1], [], []>} : vector<256x24xbf16>, vector<24x8xbf16>, vector<256x8xf32> -> vector<256x8xf32>
    %92 = arith.addf %82, %91 : vector<256x8xf32>
    %93 = vector.shape_cast %12 : vector<16x16x4xbf16> to vector<256x4xbf16>
    %c0_40 = arith.constant 0 : index
    %c0_41 = arith.constant 0 : index
    %94 = vector.load %arg8[%c0_40, %c0_41] : memref<4x8xbf16, #tpu.memory_space<vmem>>, vector<4x8xbf16>
    %cst_42 = arith.constant dense<0.000000e+00> : vector<256x8xf32>
    %95 = tpu.matmul %93, %94, %cst_42 {dimension_numbers = #tpu.dot_dimension_numbers<[1], [0], [0], [1], [0, 0, 1, 1], [], []>} : vector<256x4xbf16>, vector<4x8xbf16>, vector<256x8xf32> -> vector<256x8xf32>
    %96 = arith.addf %95, %92 : vector<256x8xf32>
    %97 = vector.shape_cast %96 : vector<256x8xf32> to vector<1x256x8xf32>
    %c0_43 = arith.constant 0 : index
    %c0_44 = arith.constant 0 : index
    %c0_45 = arith.constant 0 : index
    %98 = vector.load %arg9[%c0_43, %c0_44, %c0_45] : memref<1x256x8xf32, #tpu.memory_space<vmem>>, vector<1x256x8xf32>
    tpu.vector_store %arg9[%c0_43, %c0_44, %c0_45], %97 {strides = array<i32>} : memref<1x256x8xf32, #tpu.memory_space<vmem>>, vector<1x256x8xf32>,
    return
  }
  func.func @transform_0(%arg0: i32) -> (i32, i32, i32, i32) {
    %c0_i32 = arith.constant 0 : i32
    %c0_i32_0 = arith.constant 0 : i32
    %c0_i32_1 = arith.constant 0 : i32
    %c0_i32_2 = arith.constant 0 : i32
    return %arg0, %c0_i32, %c0_i32_0, %c0_i32_1 : i32, i32, i32, i32
  }
  func.func @transform_1(%arg0: i32) -> (i32, i32) {
    %c0_i32 = arith.constant 0 : i32
    %c0_i32_0 = arith.constant 0 : i32
    %c0_i32_1 = arith.constant 0 : i32
    return %c0_i32, %c0_i32_0 : i32, i32
  }
  func.func @transform_2(%arg0: i32) -> (i32, i32) {
    %c0_i32 = arith.constant 0 : i32
    %c0_i32_0 = arith.constant 0 : i32
    %c0_i32_1 = arith.constant 0 : i32
    return %c0_i32, %c0_i32_0 : i32, i32
  }
  func.func @transform_3(%arg0: i32) -> (i32, i32, i32) {
    %c0_i32 = arith.constant 0 : i32
    %c0_i32_0 = arith.constant 0 : i32
    %c0_i32_1 = arith.constant 0 : i32
    %c0_i32_2 = arith.constant 0 : i32
    return %c0_i32, %c0_i32_0, %c0_i32_1 : i32, i32, i32
  }
  func.func @transform_4(%arg0: i32) -> (i32, i32) {
    %c0_i32 = arith.constant 0 : i32
    %c0_i32_0 = arith.constant 0 : i32
    %c0_i32_1 = arith.constant 0 : i32
    return %c0_i32, %c0_i32_0 : i32, i32
  }
  func.func @transform_5(%arg0: i32) -> (i32, i32) {
    %c0_i32 = arith.constant 0 : i32
    %c0_i32_0 = arith.constant 0 : i32
    %c0_i32_1 = arith.constant 0 : i32
    return %c0_i32, %c0_i32_0 : i32, i32
  }
  func.func @transform_6(%arg0: i32) -> (i32, i32, i32) {
    %c0_i32 = arith.constant 0 : i32
    %c0_i32_0 = arith.constant 0 : i32
    %c0_i32_1 = arith.constant 0 : i32
    %c0_i32_2 = arith.constant 0 : i32
    return %c0_i32, %c0_i32_0, %c0_i32_1 : i32, i32, i32
  }
  func.func @transform_7(%arg0: i32) -> (i32, i32) {
    %c0_i32 = arith.constant 0 : i32
    %c0_i32_0 = arith.constant 0 : i32
    %c0_i32_1 = arith.constant 0 : i32
    return %c0_i32, %c0_i32_0 : i32, i32
  }
  func.func @transform_8(%arg0: i32) -> (i32, i32, i32) {
    %c0_i32 = arith.constant 0 : i32
    %c0_i32_0 = arith.constant 0 : i32
    %c0_i32_1 = arith.constant 0 : i32
    return %arg0, %c0_i32, %c0_i32_0 : i32, i32, i32
  }
}

</mosaic_0001>

<bundles_post_ra>
// kernel: tpu_custom_call.1
= control target key start
LH: loop header
LB: loop body
LE: loop exit
PB: predicated region body
PF: predicated region fallthrough
CT: control target
= control target key end

     0   :  { %s3846_s27 = smov 0   ;;  %s5382_s0 = inlined_call_operand.vmem [shape: f32[2,16,16,4], index: 0, kind: input, shape index: {}]   ;;  %s5383_s1 = inlined_call_operand.vmem [shape: f32[1,4], index: 1, kind: input, shape index: {}]   ;;  %s5384_s2 = inlined_call_operand.vmem [shape: f32[1,4], index: 2, kind: input, shape index: {}]   ;;  %s5385_s3 = inlined_call_operand.vmem [shape: bf16[3,12,8], index: 3, kind: input, shape index: {}]   ;;  %s5386_s4 = inlined_call_operand.vmem [shape: f32[1,8], index: 4, kind: input, shape index: {}]   ;;  %s5387_s5 = inlined_call_operand.vmem [shape: f32[1,8], index: 5, kind: input, shape index: {}]   ;;  %s5388_s6 = inlined_call_operand.vmem [shape: bf16[3,24,8], index: 6, kind: input, shape index: {}]   ;;  %s5389_s7 = inlined_call_operand.vmem [shape: bf16[4,8], index: 7, kind: input, shape index: {}]   ;;  %s5390_s8 = inlined_call_operand.vmem [shape: f32[2,256,8], index: 8, kind: output, shape index: {}]  }
   0x1 LB: > { %s3244_s28 = sadd.s32 4294967295, %s3795_s27   ;;  %p3248_p0 = scmp.ge.s32.totalorder %s3795_s27, 1  ;;  %s3795_s27 = sphi %s3846_s27, %s18_s27  }
   0x2   : > { %p262_p1 = scmp.lt.s32.totalorder %s3795_s27, 3 }
   0x4   : > { %p263_p2 = pnand %p3248_p0, %p262_p1 }
   0x6   : > { %266 = sbr.rel (%p263_p2) target bundleno = 946 (0x3b2), region = 52 }
   0xb   : > { %p296_p3 = scmp.lt.s32.totalorder %s3244_s28, 1  ;;  %v3859_v0 = vld [vmem:[%s5383_s1] ss:$0 sm:$0xff]  ;;  %vm609_vm0 = vcmask 1040384   ;;  %vm610_vm1 = vsmask.f32 256 }
   0xc   : > { %v3865_v1 = vld [vmem:[%s5384_s2] ss:$0 sm:$0xff]  ;;  %vm896_vm2 = vcmask 1046528   ;;  %vm3917_vm3 = vmand %vm609_vm0, %vm610_vm1  ;;  %vm644_vm4 = vsmask.f32 7424  ;;  %s3797_s15 = smov 8  }
   0xd   : > { %s5448_s28 = smov (!%p296_p3, %s3244_s28), 1  ;;  %s3798_s16 = smov 4   ;;  %vm1110_vm5 = vcmask 1045504   ;;  %vm976_vm6 = vcmask 31744   ;;  %vm1009_vm7 = vcmask 64512   ;;  %vm1077_vm8 = vcmask 97280  }
   0xe   : > { %s3390_s9 = sshll.u32 %s5448_s28, 8  ;;  %vm2410_vm9 = vcmask 1043456   ;;  %s3800_s17 = smov 16   ;;  %vm2992_vm10 = vcmask 1041408   ;;  %vm2303_vm11 = vcmask 130048   ;;  %vm2377_vm12 = vcmask 195584  }
   0xf   : > { %s3872_s14 = scalar_lea.vmem %s5382_s0, %s3390_s9  ;;  %s5253_s25 = scalar_lea.vmem %s5390_s8, %s3390_s9 }
  0x10   : > { %v325_v2 = vld [vmem:[%s3872_s14 + $0x90] sm:$0xff]  ;;  %v326_v3 = vld [vmem:[%s3872_s14 + $0x98] sm:$0xff]  ;;  %v323_v4 = vld [vmem:[%s3872_s14 + $0x80] sm:$0xff] }
  0x11   : > { %v365_v5 = vmul.f32 %v3859_v0, %v325_v2  ;;  %v366_v6 = vmul.f32 %v3859_v0, %v326_v3  ;;  %v324_v7 = vld [vmem:[%s3872_s14 + $0x88] sm:$0xff]  ;;  %v363_v8 = vmul.f32 %v3859_v0, %v323_v4  ;;  %v309_v9 = vld [vmem:[%s3872_s14 + $0x10] sm:$0xff]  ;;  %v310_v10 = vld [vmem:[%s3872_s14 + $0x18] sm:$0xff] }
  0x12   : > { %v364_v11 = vmul.f32 %v3859_v0, %v324_v7  ;;  %v349_v12 = vmul.f32 %v3859_v0, %v309_v9  ;;  %v350_v13 = vmul.f32 %v3859_v0, %v310_v10  ;;  %v307_v14 = vld [vmem:[%s3872_s14] sm:$0xff]  ;;  %v308_v15 = vld [vmem:[%s3872_s14 + $0x8] sm:$0xff]  ;;  %v313_v24 = vld [vmem:[%s3872_s14 + $0x30] sm:$0xff] }
  0x13   : > { %v403_v16 = vadd.f32 %v3865_v1, %v365_v5  ;;  %v404_v17 = vadd.f32 %v3865_v1, %v366_v6  ;;  %v401_v18 = vadd.f32 %v3865_v1, %v363_v8  ;;  %v347_v19 = vmul.f32 %v3859_v0, %v307_v14  ;;  %v314_v25 = vld [vmem:[%s3872_s14 + $0x38] sm:$0xff]  ;;  %v327_v30 = vld [vmem:[%s3872_s14 + $0xa0] sm:$0xff]  ;;  %v328_v47 = vld [vmem:[%s3872_s14 + $0xa8] sm:$0xff] }
  0x14   : > { %v402_v20 = vadd.f32 %v3865_v1, %v364_v11  ;;  %v387_v21 = vadd.f32 %v3865_v1, %v349_v12  ;;  %v388_v22 = vadd.f32 %v3865_v1, %v350_v13  ;;  %v348_v23 = vmul.f32 %v3859_v0, %v308_v15 }
  0x15   : > { %v435_v26 = vmax.f32 %v403_v16, 0.0  ;;  %v436_v27 = vmax.f32 %v404_v17, 0.0  ;;  %v433_v28 = vmax.f32 %v401_v18, 0.0  ;;  %v385_v29 = vadd.f32 %v3865_v1, %v347_v19 }
  0x16   : > { %v434_v31 = vmax.f32 %v402_v20, 0.0  ;;  %v419_v32 = vmax.f32 %v387_v21, 0.0  ;;  %v420_v33 = vmax.f32 %v388_v22, 0.0  ;;  %v386_v34 = vadd.f32 %v3865_v1, %v348_v23  ;;  %v329_v23 = vld [vmem:[%s3872_s14 + $0xb0] sm:$0xff] }
  0x17   : > { %v3901_v35 = vpack.c.bf16 %v436_v27, %v435_v26  ;;  %v417_v36 = vmax.f32 %v385_v29, 0.0  ;;  %v353_v37 = vmul.f32 %v3859_v0, %v313_v24  ;;  %v354_v38 = vmul.f32 %v3859_v0, %v314_v25  ;;  %v330_v24 = vld [vmem:[%s3872_s14 + $0xb8] sm:$0xff] }
  0x18   : > { %v3905_v39 = vpack.c.bf16 %v434_v31, %v433_v28  ;;  %v3907_v40 = vpack.c.bf16 %v420_v33, %v419_v32  ;;  %v418_v41 = vmax.f32 %v386_v34, 0.0  ;;  %v367_v42 = vmul.f32 %v3859_v0, %v327_v30  ;;  %v311_v33 = vld [vmem:[%s3872_s14 + $0x20] sm:$0xff] }
  0x19   : > { %5401 = vst [vmem:[#allocation2_spill] sm:$0xff] %v3901_v35  ;;  %v529_v43 = vshrl.u32 %v3901_v35, 16  ;;  %v532_v44 = vshll.u32 %v3901_v35, 16  ;;  %v391_v45 = vadd.f32 %v3865_v1, %v353_v37  ;;  %v392_v46 = vadd.f32 %v3865_v1, %v354_v38 }
  0x1a   : > { %5402 = vst [vmem:[#allocation3_spill] sm:$0xff] %v3905_v39  ;;  %v522_v49 = vshrl.u32 %v3905_v39, 16  ;;  %v525_v50 = vshll.u32 %v3905_v39, 16  ;;  %v473_v51 = vshrl.u32 %v3907_v40, 16  ;;  %v476_v52 = vshll.u32 %v3907_v40, 16 }
  0x1b   : > { %v531_v53 = vrot.slane %v529_v43, 7  ;;  %v3925_v54 = vpack.c.bf16 %v418_v41, %v417_v36  ;;  %v423_v55 = vmax.f32 %v391_v45, 0.0  ;;  %v424_v56 = vmax.f32 %v392_v46, 0.0 }
  0x1c   : > { %v524_v57 = vrot.slane %v522_v49, 7  ;;  %v475_v58 = vrot.slane %v473_v51, 7  ;;  %v368_v59 = vmul.f32 %v3859_v0, %v328_v47  ;;  %v405_v60 = vadd.f32 %v3865_v1, %v367_v42  ;;  %v312_v49 = vld [vmem:[%s3872_s14 + $0x28] sm:$0xff] }
  0x1d   : > { %v534_v61 = vor.u32 %v532_v44, %v531_v53  ;;  %v3931_v62 = vsel %vm3917_vm3, %v531_v53, 0  ;;  %v466_v63 = vshrl.u32 %v3925_v54, 16  ;;  %v469_v2 = vshll.u32 %v3925_v54, 16 }
  0x1e   : > { %v927_v3 = vrot.slane %v3931_v62, 1  ;;  %v527_v4 = vor.u32 %v525_v50, %v524_v57  ;;  %v3938_v5 = vsel %vm3917_vm3, %v524_v57, 0  ;;  %v478_v6 = vor.u32 %v476_v52, %v475_v58 }
  0x1f   : > { %v3942_v7 = vsel %vm3917_vm3, 0, %v534_v61  ;;  %v924_v8 = vrot.slane %v3938_v5, 1  ;;  %v3947_v9 = vsel %vm3917_vm3, %v475_v58, 0  ;;  %v468_v10 = vrot.slane %v466_v63, 7 }
  0x20   : > { %v926_v11 = vrot.slane %v3942_v7, 1  ;;  %v3952_v12 = vsel %vm3917_vm3, 0, %v527_v4  ;;  %v3956_v13 = vsel %vm3917_vm3, 0, %v478_v6  ;;  %v903_v14 = vrot.slane %v3947_v9, 1 }
  0x21   : > { %v923_v15 = vrot.slane %v3952_v12, 1  ;;  %v902_v16 = vrot.slane %v3956_v13, 1  ;;  %v471_v17 = vor.u32 %v469_v2, %v468_v10  ;;  %v628_v18 = vsel %vm3917_vm3, %v468_v10, 0 }
  0x22   : > { %v928_v19 = vsel %vm896_vm2, %v926_v11, %v927_v3  ;;  %v900_v20 = vrot.slane %v628_v18, 1  ;;  %v3964_v21 = vpack.c.bf16 %v424_v56, %v423_v55  ;;  %v406_v22 = vadd.f32 %v3865_v1, %v368_v59 }
  0x23   : > { %964 = vrot.lane.b32.xlu0 %v928_v19, %s3797_s15  ;;  %v925_v25 = vsel %vm896_vm2, %v923_v15, %v924_v8  ;;  %v904_v26 = vsel %vm896_vm2, %v902_v16, %v903_v14  ;;  %v3974_v27 = vsel %vm3917_vm3, 0, %v471_v17  ;;  %v437_v28 = vmax.f32 %v405_v60, 0.0 }
  0x24   : > { %962 = vrot.lane.b32.xlu1 %v925_v25, %s3797_s15  ;;  %v899_v29 = vrot.slane %v3974_v27, 1  ;;  %v487_v30 = vshrl.u32 %v3964_v21, 16  ;;  %v490_v31 = vshll.u32 %v3964_v21, 16  ;;  %v438_v32 = vmax.f32 %v406_v22, 0.0 }
  0x25   : > { %v369_v34 = vmul.f32 %v3859_v0, %v329_v23  ;;  %v370_v36 = vmul.f32 %v3859_v0, %v330_v24  ;;  %v654_v37 = vshrl.u32 %v3974_v27, 16  ;;  %v656_v38 = vshll.u32 %v3974_v27, 16 }
  0x26   : > { %v901_v41 = vsel %vm896_vm2, %v899_v29, %v900_v20  ;;  %v489_v42 = vrot.slane %v487_v30, 7  ;;  %v3986_v43 = vpack.c.bf16 %v438_v32, %v437_v28  ;;  %v661_v44 = vshll.u32 %v628_v18, 16 }
  0x27   : > { %946 = vrot.lane.b32.xlu0 %v901_v41, %s3797_s15  ;;  %v407_v45 = vadd.f32 %v3865_v1, %v369_v34  ;;  %v408_v46 = vadd.f32 %v3865_v1, %v370_v36  ;;  %v658_v47 = vrot.slane %v656_v38, 1  ;;  %v351_v50 = vmul.f32 %v3859_v0, %v311_v33 }
  0x28   : > { %5405 = vst [vmem:[#allocation4_spill] sm:$0xff] %v3986_v43  ;;  %948 = vrot.lane.b32.xlu1 %v904_v26, %s3797_s15  ;;  %v492_v51 = vor.u32 %v490_v31, %v489_v42  ;;  %v3996_v52 = vsel %vm3917_vm3, %v489_v42, 0  ;;  %v536_v53 = vshrl.u32 %v3986_v43, 16  ;;  %v539_v55 = vshll.u32 %v3986_v43, 16  ;;  %v4600_v43 = vld [vmem:[%s5388_s6 + $0x20] ss:$0 sps:$4 sm:$0xff]  }
  0x29   : > { %v909_v56 = vrot.slane %v3996_v52, 1  ;;  %v439_v57 = vmax.f32 %v407_v45, 0.0  ;;  %v440_v58 = vmax.f32 %v408_v46, 0.0  ;;  %v659_v59 = vor.u32 %v658_v47, %v654_v37 }
  0x2a   : > { %v4003_v60 = vsel %vm3917_vm3, 0, %v492_v51  ;;  %v538_v61 = vrot.slane %v536_v53, 7  ;;  %v663_v63 = vrot.slane %v661_v44, 1  ;;  %v352_v2 = vmul.f32 %v3859_v0, %v312_v49 }
  0x2b   : > { %v908_v3 = vrot.slane %v4003_v60, 1  ;;  %v4007_v4 = vpack.c.bf16 %v440_v58, %v439_v57  ;;  %v389_v6 = vadd.f32 %v3865_v1, %v351_v50  ;;  %v666_v8 = vshrl.u32 %v3956_v13, 16 }
  0x2c   : > { %v541_v10 = vor.u32 %v539_v55, %v538_v61  ;;  %v4013_v11 = vsel %vm3917_vm3, %v538_v61, 0  ;;  %v664_v14 = vsel %vm644_vm4, %v659_v59, %v663_v63  ;;  %v390_v15 = vadd.f32 %v3865_v1, %v352_v2 }
  0x2d   : > { %5406 = vst [vmem:[#allocation5_spill] sm:$0xff] %v4007_v4  ;;  %v910_v16 = vsel %vm896_vm2, %v908_v3, %v909_v56  ;;  %v930_v17 = vrot.slane %v4013_v11, 1  ;;  %v543_v18 = vshrl.u32 %v4007_v4, 16  ;;  %v546_v19 = vshll.u32 %v4007_v4, 16 }
  0x2e   : > { %952 = vrot.lane.b32.xlu1 %v910_v16, %s3797_s15  ;;  %v4024_v20 = vsel %vm3917_vm3, 0, %v541_v10  ;;  %v421_v22 = vmax.f32 %v389_v6, 0.0  ;;  %v422_v23 = vmax.f32 %v390_v15, 0.0  ;;  %v668_v24 = vshll.u32 %v3956_v13, 16 }
  0x2f   : > { %v929_v25 = vrot.slane %v4024_v20, 1  ;;  %v545_v26 = vrot.slane %v543_v18, 7  ;;  %v673_v28 = vshll.u32 %v3947_v9, 16  ;;  %v750_v29 = vshrl.u32 %v3952_v12, 16 }
  0x30   : > { %v4030_v30 = vpack.c.bf16 %v422_v23, %v421_v22  ;;  %v670_v31 = vrot.slane %v668_v24, 1  ;;  %v752_v32 = vshll.u32 %v3952_v12, 16  ;;  %v757_v33 = vshll.u32 %v3938_v5, 16 }
  0x31   : > { %v931_v34 = vsel %vm896_vm2, %v929_v25, %v930_v17  ;;  %v548_v36 = vor.u32 %v546_v19, %v545_v26  ;;  %v639_v37 = vsel %vm3917_vm3, %v545_v26, 0  ;;  %v675_v38 = vrot.slane %v673_v28, 1  ;;  %v331_v28 = vld [vmem:[%s3872_s14 + $0xc0] sm:$0xff] }
  0x32   : > { %966 = vrot.lane.b32.xlu0 %v931_v34, %s3797_s15  ;;  %v933_v41 = vrot.slane %v639_v37, 1  ;;  %835 = vrot.lane.b32.xlu1 %v664_v14, %s3798_s16  ;;  %v480_v9 = vshrl.u32 %v4030_v30, 16  ;;  %v483_v42 = vshll.u32 %v4030_v30, 16  ;;  %v671_v44 = vor.u32 %v670_v31, %v666_v8 }
  0x33   : > { %v4043_v5 = vsel %vm3917_vm3, 0, %v548_v36  ;;  %v754_v45 = vrot.slane %v752_v32, 1  ;;  %v759_v46 = vrot.slane %v757_v33, 1  ;;  %v793_v47 = vshll.u32 %v639_v37, 16  ;;  %v333_v36 = vld [vmem:[%s3872_s14 + $0xd0] sm:$0xff] }
  0x34   : > { %v932_v49 = vrot.slane %v4043_v5, 1  ;;  %v482_v50 = vrot.slane %v480_v9, 7  ;;  %v676_v51 = vsel %vm644_vm4, %v671_v44, %v675_v38  ;;  %v786_v53 = vshrl.u32 %v4043_v5, 16 }
  0x35   : > { %v755_v55 = vor.u32 %v754_v45, %v750_v29  ;;  %v788_v56 = vshll.u32 %v4043_v5, 16  ;;  %v795_v57 = vrot.slane %v793_v47, 1  ;;  %v762_v58 = vshrl.u32 %v3942_v7, 16  ;;  %v332_v29 = vld [vmem:[%s3872_s14 + $0xc8] sm:$0xff] }
  0x36   : > { %v934_v59 = vsel %vm896_vm2, %v932_v49, %v933_v41  ;;  %v485_v61 = vor.u32 %v483_v42, %v482_v50  ;;  %v630_v63 = vsel %vm3917_vm3, %v482_v50, 0  ;;  %837 = vrot.lane.b32.xlu1 %v676_v51, %s3798_s16  ;;  %v764_v2 = vshll.u32 %v3942_v7, 16  ;;  %v334_v42 = vld [vmem:[%s3872_s14 + $0xd8] sm:$0xff] }
  0x37   : > { %968 = vrot.lane.b32.xlu0 %v934_v59, %s3797_s15  ;;  %v906_v3 = vrot.slane %v630_v63, 1  ;;  %v760_v6 = vsel %vm644_vm4, %v755_v55, %v759_v46  ;;  %v790_v8 = vrot.slane %v788_v56, 1  ;;  %v769_v10 = vshll.u32 %v3931_v62, 16  ;;  %v317_v59 = vld [vmem:[%s3872_s14 + $0x50] sm:$0xff] }
  0x38   : > { %v4060_v14 = vsel %vm3917_vm3, 0, %v485_v61  ;;  %v766_v15 = vrot.slane %v764_v2, 1  ;;  %v685_v16 = vshll.u32 %v630_v63, 16  ;;  %v774_v17 = vshrl.u32 %v4024_v20, 16 }
  0x39   : > { %v905_v18 = vrot.slane %v4060_v14, 1  ;;  %v791_v19 = vor.u32 %v790_v8, %v786_v53  ;;  %v771_v22 = vrot.slane %v769_v10, 1  ;;  %v678_v23 = vshrl.u32 %v4060_v14, 16  ;;  %v315_v53 = vld [vmem:[%s3872_s14 + $0x40] sm:$0xff]  ;;  %v318_v8 = vld [vmem:[%s3872_s14 + $0x58] sm:$0xff] }
  0x3a   : > { %v767_v24 = vor.u32 %v766_v15, %v762_v58  ;;  %v680_v25 = vshll.u32 %v4060_v14, 16  ;;  %v687_v62 = vrot.slane %v685_v16, 1  ;;  %v776_v26 = vshll.u32 %v4024_v20, 16  ;;  %v316_v58 = vld [vmem:[%s3872_s14 + $0x48] sm:$0xff] }
  0x3b   : > { %v907_v31 = vsel %vm896_vm2, %v905_v18, %v906_v3  ;;  %v796_v32 = vsel %vm644_vm4, %v791_v19, %v795_v57  ;;  %v781_v33 = vshll.u32 %v4013_v11, 16  ;;  %v690_v34 = vshrl.u32 %v4003_v60, 16  ;;  %v335_v18 = vld [vmem:[%s3872_s14 + $0xe0] sm:$0xff]  ;;  %v336_v19 = vld [vmem:[%s3872_s14 + $0xe8] sm:$0xff] }
  0x3c   : > { %950 = vrot.lane.b32.xlu0 %v907_v31, %s3797_s15  ;;  %857 = vrot.lane.b32.xlu1 %v796_v32, %s3798_s16  ;;  %v772_v37 = vsel %vm644_vm4, %v767_v24, %v771_v22  ;;  %v682_v38 = vrot.slane %v680_v25, 1  ;;  %v778_v41 = vrot.slane %v776_v26, 1  ;;  %v692_v9 = vshll.u32 %v4003_v60, 16 }
  0x3d   : > { %v783_v44 = vrot.slane %v781_v33, 1  ;;  %v697_v11 = vshll.u32 %v3996_v52, 16  ;;  %v371_v45 = vmul.f32 %v3859_v0, %v331_v28  ;;  %v372_v46 = vmul.f32 %v3859_v0, %v332_v29 }
  0x3e   : > { %v683_v47 = vor.u32 %v682_v38, %v678_v23  ;;  %v779_v49 = vor.u32 %v778_v41, %v774_v17  ;;  %v694_v50 = vrot.slane %v692_v9, 1  ;;  %v373_v51 = vmul.f32 %v3859_v0, %v333_v36 }
  0x3f   : > { %v699_v55 = vrot.slane %v697_v11, 1  ;;  %v409_v56 = vadd.f32 %v3865_v1, %v371_v45  ;;  %v410_v57 = vadd.f32 %v3865_v1, %v372_v46  ;;  %v374_v52 = vmul.f32 %v3859_v0, %v334_v42 }
  0x40   : > { %851 = vrot.lane.b32.xlu0 %v760_v6, %s3798_s16  ;;  %v688_v61 = vsel %vm644_vm4, %v683_v47, %v687_v62  ;;  %v784_v63 = vsel %vm644_vm4, %v779_v49, %v783_v44  ;;  %v695_v2 = vor.u32 %v694_v50, %v690_v34  ;;  %v411_v3 = vadd.f32 %v3865_v1, %v373_v51  ;;  %v337_v44 = vld [vmem:[%s3872_s14 + $0xf0] sm:$0xff] }
  0x41   : > { %839 = vrot.lane.b32.xlu1 %v688_v61, %s3798_s16  ;;  %v441_v10 = vmax.f32 %v409_v56, 0.0  ;;  %v442_v15 = vmax.f32 %v410_v57, 0.0  ;;  %v412_v16 = vadd.f32 %v3865_v1, %v374_v52  ;;  %v355_v17 = vmul.f32 %v3859_v0, %v315_v53 }
  0x42   : > { %v700_v6 = vsel %vm644_vm4, %v695_v2, %v699_v55  ;;  %v443_v22 = vmax.f32 %v411_v3, 0.0  ;;  %v356_v23 = vmul.f32 %v3859_v0, %v316_v58  ;;  %v357_v24 = vmul.f32 %v3859_v0, %v317_v59 }
  0x43   : > { %v4102_v25 = vpack.c.bf16 %v442_v15, %v441_v10  ;;  %v444_v62 = vmax.f32 %v412_v16, 0.0  ;;  %v393_v26 = vadd.f32 %v3865_v1, %v355_v17  ;;  %v358_v28 = vmul.f32 %v3859_v0, %v318_v8 }
  0x44   : > { %853 = vrot.lane.b32.xlu0 %v772_v37, %s3798_s16  ;;  %v394_v29 = vadd.f32 %v3865_v1, %v356_v23  ;;  %v395_v31 = vadd.f32 %v3865_v1, %v357_v24  ;;  %v375_v32 = vmul.f32 %v3859_v0, %v335_v18  ;;  %v376_v33 = vmul.f32 %v3859_v0, %v336_v19 }
  0x45   : > { %5407 = vst [vmem:[#allocation6_spill] sm:$0xff] %v4102_v25  ;;  %841 = vrot.lane.b32.xlu1 %v700_v6, %s3798_s16  ;;  %v550_v34 = vshrl.u32 %v4102_v25, 16  ;;  %v553_v36 = vshll.u32 %v4102_v25, 16  ;;  %v4114_v38 = vpack.c.bf16 %v444_v62, %v443_v22  ;;  %v425_v41 = vmax.f32 %v393_v26, 0.0 }
  0x46   : > { %v426_v9 = vmax.f32 %v394_v29, 0.0  ;;  %v396_v37 = vadd.f32 %v3865_v1, %v358_v28  ;;  %v413_v42 = vadd.f32 %v3865_v1, %v375_v32  ;;  %v414_v47 = vadd.f32 %v3865_v1, %v376_v33 }
  0x47   : > { %5408 = vst [vmem:[#allocation7_spill] sm:$0xff] %v4114_v38  ;;  %v552_v11 = vrot.slane %v550_v34, 7  ;;  %v557_v45 = vshrl.u32 %v4114_v38, 16  ;;  %v560_v46 = vshll.u32 %v4114_v38, 16  ;;  %v427_v50 = vmax.f32 %v395_v31, 0.0 }
  0x48   : > { %855 = vrot.lane.b32.xlu0 %v784_v63, %s3798_s16  ;;  %v4123_v49 = vpack.c.bf16 %v426_v9, %v425_v41  ;;  %v428_v51 = vmax.f32 %v396_v37, 0.0  ;;  %v445_v53 = vmax.f32 %v413_v42, 0.0  ;;  %v377_v52 = vmul.f32 %v3859_v0, %v337_v44 }
  0x49   : > { %v555_v55 = vor.u32 %v553_v36, %v552_v11  ;;  %v640_v56 = vsel %vm3917_vm3, %v552_v11, 0  ;;  %v559_v57 = vrot.slane %v557_v45, 7  ;;  %v446_v2 = vmax.f32 %v414_v47, 0.0  ;;  %v338_v45 = vld [vmem:[%s3872_s14 + $0xf8] sm:$0xff] }
  0x4a   : > { %v805_v58 = vshll.u32 %v640_v56, 16  ;;  %v936_v59 = vrot.slane %v640_v56, 1  ;;  %v494_v61 = vshrl.u32 %v4123_v49, 16  ;;  %v497_v10 = vshll.u32 %v4123_v49, 16 }
  0x4b   : > { %v4131_v63 = vsel %vm3917_vm3, 0, %v555_v55  ;;  %v562_v3 = vor.u32 %v560_v46, %v559_v57  ;;  %v641_v8 = vsel %vm3917_vm3, %v559_v57, 0  ;;  %v4138_v18 = vpack.c.bf16 %v428_v51, %v427_v50 }
  0x4c   : > { %v798_v15 = vshrl.u32 %v4131_v63, 16  ;;  %v800_v16 = vshll.u32 %v4131_v63, 16  ;;  %v817_v17 = vshll.u32 %v641_v8, 16  ;;  %v807_v19 = vrot.slane %v805_v58, 1 }
  0x4d   : > { %v4142_v6 = vsel %vm3917_vm3, 0, %v562_v3  ;;  %v935_v22 = vrot.slane %v4131_v63, 1  ;;  %v496_v23 = vrot.slane %v494_v61, 7  ;;  %v939_v28 = vrot.slane %v641_v8, 1 }
  0x4e   : > { %v802_v24 = vrot.slane %v800_v16, 1  ;;  %v810_v62 = vshrl.u32 %v4142_v6, 16  ;;  %v812_v26 = vshll.u32 %v4142_v6, 16  ;;  %v819_v29 = vrot.slane %v817_v17, 1 }
  0x4f   : > { %v937_v31 = vsel %vm896_vm2, %v935_v22, %v936_v59  ;;  %v499_v32 = vor.u32 %v497_v10, %v496_v23  ;;  %v632_v33 = vsel %vm3917_vm3, %v496_v23, 0  ;;  %v501_v9 = vshrl.u32 %v4138_v18, 16 }
  0x50   : > { %v803_v34 = vor.u32 %v802_v24, %v798_v15  ;;  %v814_v36 = vrot.slane %v812_v26, 1  ;;  %v709_v41 = vshll.u32 %v632_v33, 16  ;;  %v938_v42 = vrot.slane %v4142_v6, 1 }
  0x51   : > { %v4153_v37 = vsel %vm3917_vm3, 0, %v499_v32  ;;  %v504_v44 = vshll.u32 %v4138_v18, 16  ;;  %v912_v11 = vrot.slane %v632_v33, 1  ;;  %v503_v56 = vrot.slane %v501_v9, 7  ;;  %v320_v33 = vld [vmem:[%s3872_s14 + $0x68] sm:$0xff] }
  0x52   : > { %v808_v46 = vsel %vm644_vm4, %v803_v34, %v807_v19  ;;  %v815_v47 = vor.u32 %v814_v36, %v810_v62  ;;  %v702_v50 = vshrl.u32 %v4153_v37, 16  ;;  %v704_v51 = vshll.u32 %v4153_v37, 16  ;;  %v319_v62 = vld [vmem:[%s3872_s14 + $0x60] sm:$0xff] }
  0x53   : > { %859 = vrot.lane.b32.xlu0 %v808_v46, %s3798_s16  ;;  %v711_v55 = vrot.slane %v709_v41, 1  ;;  %v911_v57 = vrot.slane %v4153_v37, 1  ;;  %v4163_v58 = vpack.c.bf16 %v446_v2, %v445_v53  ;;  %v378_v3 = vmul.f32 %v3859_v0, %v338_v45 }
  0x54   : > { %v820_v59 = vsel %vm644_vm4, %v815_v47, %v819_v29  ;;  %v706_v61 = vrot.slane %v704_v51, 1  ;;  %v415_v8 = vadd.f32 %v3865_v1, %v377_v52  ;;  %v506_v10 = vor.u32 %v504_v44, %v503_v56  ;;  %v321_v51 = vld [vmem:[%s3872_s14 + $0x70] sm:$0xff] }
  0x55   : > { %5409 = vst [vmem:[#allocation8_spill] sm:$0xff] %v4163_v58  ;;  %861 = vrot.lane.b32.xlu1 %v820_v59, %s3798_s16  ;;  %v633_v15 = vsel %vm3917_vm3, %v503_v56, 0  ;;  %v564_v16 = vshrl.u32 %v4163_v58, 16  ;;  %v940_v53 = vsel %vm896_vm2, %v938_v42, %v939_v28  ;;  %v567_v19 = vshll.u32 %v4163_v58, 16 }
  0x56   : > { %v707_v17 = vor.u32 %v706_v61, %v702_v50  ;;  %v721_v2 = vshll.u32 %v633_v15, 16  ;;  %v4177_v52 = vsel %vm3917_vm3, 0, %v506_v10  ;;  %v416_v23 = vadd.f32 %v3865_v1, %v378_v3  ;;  %v322_v61 = vld [vmem:[%s3872_s14 + $0x78] sm:$0xff] }
  0x57   : > { %970 = vrot.lane.b32.xlu0 %v937_v31, %s3797_s15  ;;  %v566_v22 = vrot.slane %v564_v16, 7  ;;  %v447_v24 = vmax.f32 %v415_v8, 0.0  ;;  %v714_v29 = vshrl.u32 %v4177_v52, 16  ;;  %v716_v28 = vshll.u32 %v4177_v52, 16 }
  0x58   : > { %v712_v26 = vsel %vm644_vm4, %v707_v17, %v711_v55  ;;  %v913_v32 = vsel %vm896_vm2, %v911_v57, %v912_v11  ;;  %v915_v31 = vrot.slane %v633_v15, 1  ;;  %v448_v41 = vmax.f32 %v416_v23, 0.0 }
  0x59   : > { %843 = vrot.lane.b32.xlu1 %v712_v26, %s3798_s16  ;;  %v569_v34 = vor.u32 %v567_v19, %v566_v22  ;;  %v642_v36 = vsel %vm3917_vm3, %v566_v22, 0  ;;  %v718_v9 = vrot.slane %v716_v28, 1  ;;  %v723_v42 = vrot.slane %v721_v2, 1  ;;  %v3780_v19 = vld [vmem:[%s5385_s3 + $0x8] sm:$0x3f]  }
  0x5a   : > { %v829_v44 = vshll.u32 %v642_v36, 16  ;;  %v359_v45 = vmul.f32 %v3859_v0, %v319_v62  ;;  %v914_v11 = vrot.slane %v4177_v52, 1  ;;  %v4196_v47 = vpack.c.bf16 %v448_v41, %v447_v24  ;;  %3760 = vmatprep.subr.msk.bf16.mxu0 %vm1110_vm5, %v3780_v19  ;;  %3761 = vmatprep.subr.msk.bf16.mxu1 %vm1110_vm5, %v3780_v19 }
  0x5b   : > { %972 = vrot.lane.b32.xlu0 %v940_v53, %s3797_s15  ;;  %v4194_v46 = vsel %vm3917_vm3, 0, %v569_v34  ;;  %v360_v50 = vmul.f32 %v3859_v0, %v320_v33  ;;  %v719_v55 = vor.u32 %v718_v9, %v714_v29  ;;  %v942_v59 = vrot.slane %v642_v36, 1 }
  0x5c   : > { %5410 = vst [vmem:[#allocation9_spill] sm:$0xff] %v4196_v47  ;;  %v822_v56 = vshrl.u32 %v4194_v46, 16  ;;  %v824_v57 = vshll.u32 %v4194_v46, 16  ;;  %v831_v3 = vrot.slane %v829_v44, 1  ;;  %v571_v8 = vshrl.u32 %v4196_v47, 16 }
  0x5d   : > { %v574_v10 = vshll.u32 %v4196_v47, 16  ;;  %v397_v15 = vadd.f32 %v3865_v1, %v359_v45  ;;  %v724_v16 = vsel %vm644_vm4, %v719_v55, %v723_v42  ;;  %v398_v53 = vadd.f32 %v3865_v1, %v360_v50  ;;  %v3782_v45 = vld [vmem:[%s5385_s3 + $0x10] sm:$0x3f]  }
  0x5e   : > { %v826_v17 = vrot.slane %v824_v57, 1  ;;  %v361_v2 = vmul.f32 %v3859_v0, %v321_v51  ;;  %845 = vrot.lane.b32.xlu1 %v724_v16, %s3798_s16  ;;  %v916_v22 = vsel %vm896_vm2, %v914_v11, %v915_v31  ;;  %v573_v23 = vrot.slane %v571_v8, 7 }
  0x5f   : > { %954 = vrot.lane.b32.xlu0 %v913_v32, %s3797_s15  ;;  %v429_v24 = vmax.f32 %v397_v15, 0.0  ;;  %v362_v62 = vmul.f32 %v3859_v0, %v322_v61  ;;  %v941_v29 = vrot.slane %v4194_v46, 1  ;;  %v430_v28 = vmax.f32 %v398_v53, 0.0  ;;  %v3781_v0 = vld [vmem:[%s5385_s3] sm:$0x3f]  }
  0x60   : > { %v827_v26 = vor.u32 %v826_v17, %v822_v56  ;;  %v399_v33 = vadd.f32 %v3865_v1, %v361_v2  ;;  %v576_v34 = vor.u32 %v574_v10, %v573_v23  ;;  %v643_v36 = vsel %vm3917_vm3, %v573_v23, 0 }
  0x61   : > { %v400_v41 = vadd.f32 %v3865_v1, %v362_v62  ;;  %v1052_v31 = vshll.u32 %v643_v36, 16  ;;  %v4222_v9 = vpack.c.bf16 %v430_v28, %v429_v24  ;;  %v943_v11 = vsel %vm896_vm2, %v941_v29, %v942_v59 }
  0x62   : > { %v832_v32 = vsel %vm644_vm4, %v827_v26, %v831_v3  ;;  %956 = vrot.lane.b32.xlu1 %v916_v22, %s3797_s15  ;;  %v4233_v1 = vsel %vm3917_vm3, 0, %v576_v34  ;;  %v431_v42 = vmax.f32 %v399_v33, 0.0  ;;  %v1112_v10 = vsel %vm1110_vm5, %v3780_v19, 0 }
  0x63   : > { %5411 = vst [vmem:[#allocation10_spill] sm:$0xff] %v4222_v9  ;;  %863 = vrot.lane.b32.xlu0 %v832_v32, %s3798_s16  ;;  %v432_v44 = vmax.f32 %v400_v41, 0.0  ;;  %v1045_v50 = vshrl.u32 %v4233_v1, 16  ;;  %v1047_v51 = vshll.u32 %v4233_v1, 16  ;;  %v508_v55 = vshrl.u32 %v4222_v9, 16  ;;  %3515 = vmatpush3.bf16.msra.mxu0 %v1112_v10 }
  0x64   : > { %v1054_v56 = vrot.slane %v1052_v31, 1  ;;  %v511_v57 = vshll.u32 %v4222_v9, 16  ;;  %v4247_v15 = vsel %vm1110_vm5, %v3781_v0, 0  ;;  %v1061_v59 = vrot.slane %v643_v36, 1  ;;  %3759 = vmatpush3.bf16.msra.mxu1 %v1112_v10  ;;  %3763 = vmatprep.subr.msk.bf16.mxu0 %vm1110_vm5, %v3782_v45 }
  0x65   : > { %v4243_v61 = vpack.c.bf16 %v432_v44, %v431_v42  ;;  %v1049_v3 = vrot.slane %v1047_v51, 1  ;;  %v510_v8 = vrot.slane %v508_v55, 7  ;;  %v4253_v53 = vsel %vm1110_vm5, %v3782_v45, 0  ;;  %3762 = vmatprep.subr.msk.bf16.mxu1 %vm1110_vm5, %v3781_v0 }
  0x66   : > { %974 = vrot.lane.b32.xlu1 %v943_v11, %s3797_s15  ;;  %v1060_v19 = vrot.slane %v4233_v1, 1 }
  0x67   : > { %5412 = vst [vmem:[#allocation11_spill] sm:$0xff] %v4243_v61  ;;  %v515_v16 = vshrl.u32 %v4243_v61, 16  ;;  %v518_v17 = vshll.u32 %v4243_v61, 16  ;;  %v1050_v2 = vor.u32 %v1049_v3, %v1045_v50  ;;  %v513_v22 = vor.u32 %v511_v57, %v510_v8 }
  0x68   : > { %v634_v23 = vsel %vm3917_vm3, %v510_v8, 0  ;;  %v1062_v36 = vsel %vm896_vm2, %v1060_v19, %v1061_v59 }
  0x69   : > { %v733_v24 = vshll.u32 %v634_v23, 16  ;;  %v517_v62 = vrot.slane %v515_v16, 7  ;;  %v1055_v26 = vsel %vm644_vm4, %v1050_v2, %v1054_v56  ;;  %v4263_v29 = vsel %vm3917_vm3, 0, %v513_v22 }
  0x6a   : > { %1056 = vrot.lane.b32.xlu0 %v1055_v26, %s3798_s16  ;;  %v726_v28 = vshrl.u32 %v4263_v29, 16  ;;  %v728_v33 = vshll.u32 %v4263_v29, 16  ;;  %v917_v32 = vrot.slane %v4263_v29, 1  ;;  %v918_v31 = vrot.slane %v634_v23, 1 }
  0x6b   : > { %v520_v34 = vor.u32 %v518_v17, %v517_v62  ;;  %v635_v41 = vsel %vm3917_vm3, %v517_v62, 0  ;;  %v735_v42 = vrot.slane %v733_v24, 1  ;;  %v3799_v16 = vmov 0  }
  0x6c   : > { %v730_v0 = vrot.slane %v728_v33, 1  ;;  %v745_v45 = vshll.u32 %v635_v41, 16  ;;  %v919_v57 = vsel %vm896_vm2, %v917_v32, %v918_v31  ;;  %v921_v59 = vrot.slane %v635_v41, 1 }
  0x6d   : > { %v4274_v44 = vsel %vm3917_vm3, 0, %v520_v34  ;;  %v4284_v17 = vrot.slane %v3799_v16, 1 }
  0x6e   : > { %v738_v11 = vshrl.u32 %v4274_v44, 16  ;;  %v740_v50 = vshll.u32 %v4274_v44, 16  ;;  %v731_v51 = vor.u32 %v730_v0, %v726_v28  ;;  %1063 = vrot.lane.b32.xlu0 %v1062_v36, %s3797_s15  ;;  %v747_v56 = vrot.slane %v745_v45, 1 }
  0x6f   : > { %v920_v10 = vrot.slane %v4274_v44, 1 }
  0x70   : > { %v742_v55 = vrot.slane %v740_v50, 1  ;;  %v736_v3 = vsel %vm644_vm4, %v731_v51, %v735_v42 }
  0x71   : > { %847 = vrot.lane.b32.xlu1 %v736_v3, %s3798_s16  ;;  %v922_v22 = vsel %vm896_vm2, %v920_v10, %v921_v59 }
  0x72   : > { %v743_v8 = vor.u32 %v742_v55, %v738_v11  ;;  %958 = vrot.lane.b32.xlu0 %v919_v57, %s3797_s15 }
  0x74   : > { %v748_v2 = vsel %vm644_vm4, %v743_v8, %v747_v56 }
  0x75   : > { %849 = vrot.lane.b32.xlu1 %v748_v2, %s3798_s16 }
  0x76   : > { %833 = vrot.lane.b32.xlu0 %v4284_v17, %s3798_s16 }
  0x79   : > { %960 = vrot.lane.b32.xlu1 %v922_v22, %s3797_s15 }
  0x7d   : > { %944 = vrot.lane.b32.xlu1 %v4284_v17, %s3797_s15 }
  0x81   : > { %2132 = vrot.lane.b32.xlu1 %v4284_v17, %s3797_s15 }
  0x95   : > { %v965_v19 = vpop.permute.xlu0 %964 }
  0x96   : > { %v963_v23 = vpop.permute.xlu1 %962 }
  0x99   : > { %v947_v62 = vpop.permute.xlu0 %946 }
  0x9a   : > { %v949_v24 = vpop.permute.xlu1 %948 }
  0xa0   : > { %v953_v26 = vpop.permute.xlu1 %952 }
  0xa4   : > { %v967_v28 = vpop.permute.xlu0 %966  ;;  %v836_v33 = vpop.permute.xlu1 %835 }
  0xa5   : > { %v980_v34 = vsel %vm976_vm6, %v3974_v27, %v836_v33 }
  0xa6   : > { %v4299_v36 = vsel %vm1009_vm7, %v980_v34, %v947_v62 }
  0xa7   : > { %3516 = vmatprep.mubr.msk.bf16.mxu0 %vm1077_vm8, %v4299_v36 }
  0xa8   : > { %v838_v41 = vpop.permute.xlu1 %837 }
  0xa9   : > { %v969_v32 = vpop.permute.xlu0 %968  ;;  %v982_v31 = vsel %vm976_vm6, %v3956_v13, %v838_v41 }
  0xaa   : > { %v4306_v0 = vsel %vm1009_vm7, %v982_v31, %v949_v24 }
  0xab   : > { %3517 = vmatmul.mubr.msk.bf16.vlgmr.msra.gmra.mxu0 %vm1077_vm8, %v4306_v0 }
  0xac   : > { %3583 = vmatpush3.bf16.msra.mxu0 %v4253_v53 }
  0xae   : > { %v951_v27 = vpop.permute.xlu0 %950  ;;  %v858_v42 = vpop.permute.xlu1 %857 }
  0xaf   : > { %v1002_v59 = vsel %vm976_vm6, %v4043_v5, %v858_v42 }
  0xb2   : > { %v852_v45 = vpop.permute.xlu0 %851 }
  0xb3   : > { %v996_v11 = vsel %vm976_vm6, %v3952_v12, %v852_v45  ;;  %v840_v50 = vpop.permute.xlu1 %839 }
  0xb4   : > { %v4314_v51 = vsel %vm1009_vm7, %v996_v11, %v963_v23  ;;  %v984_v13 = vsel %vm976_vm6, %v4060_v14, %v840_v50 }
  0xb5   : > { %3532 = vmatprep.mubr.msk.bf16.mxu1 %vm1077_vm8, %v4314_v51  ;;  %v4321_v55 = vsel %vm1009_vm7, %v984_v13, %v951_v27 }
  0xb6   : > { %v854_v53 = vpop.permute.xlu0 %853  ;;  %3520 = vmatprep.mubr.msk.bf16.mxu0 %vm1077_vm8, %v4321_v55 }
  0xb7   : > { %v998_v12 = vsel %vm976_vm6, %v3942_v7, %v854_v53  ;;  %v842_v56 = vpop.permute.xlu1 %841 }
  0xb8   : > { %v4328_v57 = vsel %vm1009_vm7, %v998_v12, %v965_v19  ;;  %v986_v14 = vsel %vm976_vm6, %v4003_v60, %v842_v56  ;;  %v4347_v60 = vsel %vm1009_vm7, %v1002_v59, %v969_v32 }
  0xb9   : > { %3533 = vmatmul.mubr.msk.bf16.vlgmr.msra.gmra.mxu1 %vm1077_vm8, %v4328_v57  ;;  %v1019_v3 = vsel %vm1009_vm7, %v986_v14, %v953_v26 }
  0xba   : > { %v856_v8 = vpop.permute.xlu0 %855  ;;  %3521 = vmatmul.mubr.msk.bf16.gmra.mxu0 %vm1077_vm8, %v1019_v3  ;;  %3549 = vmatpush3.bf16.msra.mxu1 %v4247_v15 }
  0xbb   : > { %v1000_v7 = vsel %vm976_vm6, %v4024_v20, %v856_v8 }
  0xbc   : > { %v4340_v10 = vsel %vm1009_vm7, %v1000_v7, %v967_v28 }
  0xbd   : > { %3536 = vmatprep.mubr.msk.bf16.mxu1 %vm1077_vm8, %v4340_v10 }
  0xc1   : > { %3537 = vmatmul.mubr.msk.bf16.gmra.mxu1 %vm1077_vm8, %v4347_v60 }
  0xc5   : > { %v860_v16 = vpop.permute.xlu0 %859 }
  0xc6   : > { %v1004_v20 = vsel %vm976_vm6, %v4131_v63, %v860_v16 }
  0xc7   : > { %v862_v15 = vpop.permute.xlu1 %861 }
  0xc8   : > { %v1006_v5 = vsel %vm976_vm6, %v4142_v6, %v862_v15 }
  0xc9   : > { %v971_v2 = vpop.permute.xlu0 %970 }
  0xca   : > { %v4354_v22 = vsel %vm1009_vm7, %v1004_v20, %v971_v2 }
  0xcb   : > { %v844_v23 = vpop.permute.xlu1 %843  ;;  %3540 = vmatprep.mubr.msk.bf16.mxu1 %vm1077_vm8, %v4354_v22 }
  0xcc   : > { %v988_v62 = vsel %vm976_vm6, %v4153_v37, %v844_v23 }
  0xcd   : > { %v973_v19 = vpop.permute.xlu0 %972 }
  0xce   : > { %v1039_v24 = vsel %vm1009_vm7, %v1006_v5, %v973_v19 }
  0xcf   : > { %3541 = vmatmul.mubr.msk.bf16.gmra.mxu1 %vm1077_vm8, %v1039_v24 }
  0xd0   : > { %v846_v63 = vpop.permute.xlu1 %845 }
  0xd1   : > { %v955_v26 = vpop.permute.xlu0 %954  ;;  %v990_v33 = vsel %vm976_vm6, %v4177_v52, %v846_v63 }
  0xd2   : > { %v1021_v28 = vsel %vm1009_vm7, %v988_v62, %v955_v26 }
  0xd3   : > { %3524 = vmatprep.mubr.msk.bf16.mxu0 %vm1077_vm8, %v1021_v28 }
  0xd4   : > { %v957_v34 = vpop.permute.xlu1 %956 }
  0xd5   : > { %v864_v41 = vpop.permute.xlu0 %863  ;;  %v1023_v6 = vsel %vm1009_vm7, %v990_v33, %v957_v34 }
  0xd6   : > { %3525 = vmatmul.mubr.msk.bf16.gmra.mxu0 %vm1077_vm8, %v1023_v6  ;;  %v1008_v32 = vsel %vm976_vm6, %v4194_v46, %v864_v41 }
  0xd8   : > { %v975_v31 = vpop.permute.xlu1 %974 }
  0xd9   : > { %v1041_v37 = vsel %vm1009_vm7, %v1008_v32, %v975_v31  ;;  %v3783_v32 = vld [vmem:[%s5388_s6 + $0x14] ss:$0 sps:$4 sm:$0xff]  }
  0xda   : > { %3544 = vmatprep.mubr.msk.bf16.mxu1 %vm1077_vm8, %v1041_v37  ;;  %3764 = vmatprep.subr.msk.bf16.mxu1 %vm2410_vm9, %v3783_v32 }
  0xdc   : > { %v1057_v27 = vpop.permute.xlu0 %1056 }
  0xdd   : > { %v1066_v42 = vsel %vm976_vm6, %v4233_v1, %v1057_v27  ;;  %v3784_v27 = vld [vmem:[%s5388_s6 + $0x8] ss:$0 sps:$4 sm:$0xff]  }
  0xde   : > { %3765 = vmatprep.subr.msk.bf16.mxu0 %vm2410_vm9, %v3784_v27 }
  0xe0   : > { %v1064_v45 = vpop.permute.xlu0 %1063 }
  0xe1   : > { %v1068_v52 = vsel %vm1009_vm7, %v1066_v42, %v1064_v45 }
  0xe2   : > { %3545 = vmatmul.mubr.msk.bf16.gmra.mxu1 %vm1077_vm8, %v1068_v52 }
  0xe3   : > { %v848_v11 = vpop.permute.xlu1 %847 }
  0xe4   : > { %v992_v50 = vsel %vm976_vm6, %v4263_v29, %v848_v11  ;;  %v959_v13 = vpop.permute.xlu0 %958 }
  0xe5   : > { %v1025_v46 = vsel %vm1009_vm7, %v992_v50, %v959_v13  ;;  %v3785_v13 = vld [vmem:[%s5388_s6 + $0xc] sm:$0xff]  }
  0xe6   : > { %3528 = vmatprep.mubr.msk.bf16.mxu0 %vm1077_vm8, %v1025_v46 }
  0xe7   : > { %v850_v53 = vpop.permute.xlu1 %849 }
  0xe8   : > { %v834_v12 = vpop.permute.xlu0 %833  ;;  %v994_v56 = vsel %vm976_vm6, %v4274_v44, %v850_v53 }
  0xe9   : > { %v978_v8 = vsel %vm976_vm6, 0, %v834_v12 }
  0xeb   : > { %v961_v1 = vpop.permute.xlu1 %960 }
  0xec   : > { %v1027_v14 = vsel %vm1009_vm7, %v994_v56, %v961_v1 }
  0xed   : > { %3529 = vmatmul.mubr.msk.bf16.gmra.mxu0 %vm1077_vm8, %v1027_v14 }
  0xee   : > { %3584 = vmatprep.mubr.msk.bf16.mxu0 %vm1077_vm8, %v4306_v0 }
  0xef   : > { %v945_v29 = vpop.permute.xlu1 %944 }
  0xf0   : > { %v1011_v7 = vsel %vm1009_vm7, %v978_v8, %v945_v29  ;;  %v4506_v29 = vld [vmem:[%s5386_s4] ss:$0 sm:$0xff] }
  0xf1   : > { %3550 = vmatprep.mubr.msk.bf16.mxu1 %vm1077_vm8, %v1011_v7 }
  0xf2   : > { %3551 = vmatmul.mubr.msk.bf16.vlgmr.msra.gmra.mxu1 %vm1077_vm8, %v4299_v36 }
  0xf3   : > { %3554 = vmatprep.mubr.msk.bf16.mxu1 %vm1077_vm8, %v4306_v0 }
  0xf5   : > { %3585 = vmatmul.mubr.msk.bf16.vlgmr.msra.gmra.mxu0 %vm1077_vm8, %v4321_v55 }
  0xf6   : > { %3588 = vmatprep.mubr.msk.bf16.mxu0 %vm1077_vm8, %v1019_v3 }
  0xfa   : > { %3555 = vmatmul.mubr.msk.bf16.gmra.mxu1 %vm1077_vm8, %v4321_v55 }
  0xfb   : > { %3558 = vmatprep.mubr.msk.bf16.mxu1 %vm1077_vm8, %v1019_v3 }
  0xfd   : > { %3589 = vmatmul.mubr.msk.bf16.gmra.mxu0 %vm1077_vm8, %v1021_v28 }
  0xfe   : > { %3592 = vmatprep.mubr.msk.bf16.mxu0 %vm1077_vm8, %v1023_v6 }
 0x102   : > { %3559 = vmatmul.mubr.msk.bf16.gmra.mxu1 %vm1077_vm8, %v1021_v28 }
 0x103   : > { %3562 = vmatprep.mubr.msk.bf16.mxu1 %vm1077_vm8, %v1023_v6 }
 0x105   : > { %3593 = vmatmul.mubr.msk.bf16.gmra.mxu0 %vm1077_vm8, %v1025_v46 }
 0x106   : > { %3596 = vmatprep.mubr.msk.bf16.mxu0 %vm1077_vm8, %v1027_v14 }
 0x10a   : > { %3563 = vmatmul.mubr.msk.bf16.gmra.mxu1 %vm1077_vm8, %v1025_v46  ;;  %v3786_v46 = vld [vmem:[%s5388_s6] sm:$0xff]  }
 0x10b   : > { %3566 = vmatprep.mubr.msk.bf16.mxu1 %vm1077_vm8, %v1027_v14 }
 0x10d   : > { %3597 = vmatmul.mubr.msk.bf16.gmra.mxu0 %vm1077_vm8, %v4314_v51 }
 0x10e   : > { %3600 = vmatprep.mubr.msk.bf16.mxu0 %vm1077_vm8, %v4328_v57 }
 0x112   : > { %3567 = vmatmul.mubr.msk.bf16.gmra.mxu1 %vm1077_vm8, %v4314_v51 }
 0x113   : > { %3570 = vmatprep.mubr.msk.bf16.mxu1 %vm1077_vm8, %v4328_v57 }
 0x115   : > { %3601 = vmatmul.mubr.msk.bf16.gmra.mxu0 %vm1077_vm8, %v4340_v10 }
 0x116   : > { %3604 = vmatprep.mubr.msk.bf16.mxu0 %vm1077_vm8, %v4347_v60 }
 0x11a   : > { %3571 = vmatmul.mubr.msk.bf16.gmra.mxu1 %vm1077_vm8, %v4340_v10 }
 0x11b   : > { %3574 = vmatprep.mubr.msk.bf16.mxu1 %vm1077_vm8, %v4347_v60 }
 0x11d   : > { %3605 = vmatmul.mubr.msk.bf16.gmra.mxu0 %vm1077_vm8, %v4354_v22 }
 0x11e   : > { %3608 = vmatprep.mubr.msk.bf16.mxu0 %vm1077_vm8, %v1039_v24 }
 0x122   : > { %3575 = vmatmul.mubr.msk.bf16.gmra.mxu1 %vm1077_vm8, %v4354_v22 }
 0x123   : > { %3578 = vmatprep.mubr.msk.bf16.mxu1 %vm1077_vm8, %v1039_v24 }
 0x125   : > { %3609 = vmatmul.mubr.msk.bf16.gmra.mxu0 %vm1077_vm8, %v1041_v37 }
 0x126   : > { %3612 = vmatprep.mubr.msk.bf16.mxu0 %vm1077_vm8, %v1068_v52  ;;  %v2587_v52 = vsel %vm2410_vm9, %v3784_v27, 0 }
 0x127   : > { %3653 = vmatpush3.bf16.msra.mxu0 %v2587_v52 }
 0x128   : > { %3654 = vmatprep.subr.bf16.mxu0 %v3786_v46 }
 0x12a   : > { %3579 = vmatmul.mubr.msk.bf16.gmra.mxu1 %vm1077_vm8, %v1041_v37  ;;  %v2412_v37 = vsel %vm2410_vm9, %v3783_v32, 0 }
 0x12b   : > { %3617 = vmatpush3.bf16.msra.mxu1 %v2412_v37  ;;  %3655 = vmatpush3.bf16.msra.mxu0 %v3786_v46 }
 0x12c   : > { %3618 = vmatprep.subr.bf16.mxu1 %v3785_v13 }
 0x12d   : > { %3613 = vmatmul.mubr.msk.bf16.gmra.mxu0 %vm1077_vm8, %v1011_v7 }
 0x12f   : > { %3619 = vmatpush3.bf16.msra.mxu1 %v3785_v13 }
 0x130   : > { %3766 = vmatprep.subr.msk.bf16.mxu1 %vm2410_vm9, %v4600_v43 }
 0x16b   : > { %v3518_v55 = vpop.f32.mrf.mxu0 }
 0x16d   : > { %v1148_v3 = vpop.f32.mrf.mxu0 }
 0x16f   : > { %v3519_v59 = vpop.f32.mrf.mxu0 }
 0x171   : > { %v1151_v16 = vpop.f32.mrf.mxu0 }
 0x179   : > { %v4435_v44 = vpop.f32.mrf.mxu1 }
 0x17a   : > { %v3522_v15 = vpop.f32.mrf.mxu0 }
 0x17b   : > { %v4437_v36 = vpop.f32.mrf.mxu1 }
 0x17c   : > { %v1164_v2 = vpop.f32.mrf.mxu0 }
 0x17d   : > { %v4439_v0 = vpop.f32.mrf.mxu1 }
 0x17e   : > { %v4453_v23 = vpop.f32.mrf.mxu0 }
 0x17f   : > { %v4441_v51 = vpop.f32.mrf.mxu1 }
 0x180   : > { %v4457_v19 = vpop.f32.mrf.mxu0 }
 0x181   : > { %v4443_v57 = vpop.f32.mrf.mxu1 }
 0x183   : > { %v4445_v10 = vpop.f32.mrf.mxu1 }
 0x185   : > { %v4447_v60 = vpop.f32.mrf.mxu1 }
 0x187   : > { %v4449_v20 = vpop.f32.mrf.mxu1 }
 0x18f   : > { %v4451_v22 = vpop.f32.mrf.mxu1 }
 0x191   : > { %v4455_v5 = vpop.f32.mrf.mxu1 }
 0x193   : > { %v4459_v24 = vpop.f32.mrf.mxu1 }
 0x195   : > { %v4463_v63 = vpop.f32.mrf.mxu1 }
 0x196   : > { %v4461_v62 = vpop.f32.mrf.mxu0 }
 0x198   : > { %v4465_v26 = vpop.f32.mrf.mxu0 }
 0x19a   : > { %v4469_v33 = vpop.f32.mrf.mxu0 }
 0x19c   : > { %v4473_v41 = vpop.f32.mrf.mxu0 }
 0x1a2   : > { %v4467_v28 = vpop.f32.mrf.mxu1 }
 0x1a4   : > { %v4471_v34 = vpop.f32.mrf.mxu1 }
 0x1a6   : > { %v4475_v6 = vpop.f32.mrf.mxu1 }
 0x1a8   : > { %v4489_v45 = vpop.f32.mrf.mxu1 }
 0x1ad   : > { %v4480_v31 = vpop.f32.mrf.mxu0 }
 0x1af   : > { %v4487_v42 = vpop.f32.mrf.mxu0 }
 0x1b1   : > { %v4493_v11 = vpop.f32.mrf.mxu0 }
 0x1b2   : > { %v3552_v50 = vpop.f32.mrf.mxu1 }
 0x1b3   : > { %v1328_v53 = vadd.f32 %v3552_v50, %v3518_v55  ;;  %v4501_v12 = vpop.f32.mrf.mxu0 }
 0x1b4   : > { %v1319_v56 = vpop.f32.mrf.mxu1 }
 0x1b5   : > { %v1320_v1 = vadd.f32 %v1319_v56, %v1148_v3  ;;  %v3586_v14 = vpop.f32.mrf.mxu0  ;;  %v4512_v3 = vld [vmem:[%s5387_s5] ss:$0 sm:$0xff] }
 0x1b6   : > { %v1620_v8 = vadd.f32 %v3586_v14, %v1328_v53  ;;  %v3553_v7 = vpop.f32.mrf.mxu1 }
 0x1b7   : > { %v1331_v32 = vadd.f32 %v3553_v7, %v3519_v59  ;;  %v1491_v37 = vpop.f32.mrf.mxu0 }
 0x1b8   : > { %v1618_v27 = vadd.f32 %v1491_v37, %v1320_v1  ;;  %v1322_v55 = vpop.f32.mrf.mxu1  ;;  %v1659_v52 = vmul.f32 %v4506_v29, %v1620_v8 }
 0x1b9   : > { %v1323_v50 = vadd.f32 %v1322_v55, %v1151_v16  ;;  %v3587_v47 = vpop.f32.mrf.mxu0 }
 0x1ba   : > { %v1657_v13 = vmul.f32 %v4506_v29, %v1618_v27  ;;  %v1621_v46 = vadd.f32 %v3587_v47, %v1331_v32  ;;  %v3556_v53 = vpop.f32.mrf.mxu1  ;;  %v1698_v37 = vadd.f32 %v4512_v3, %v1659_v52 }
 0x1bb   : > { %v1344_v56 = vadd.f32 %v3556_v53, %v3522_v15  ;;  %v1494_v14 = vpop.f32.mrf.mxu0 }
 0x1bc   : > { %v1660_v59 = vmul.f32 %v4506_v29, %v1621_v46  ;;  %v1619_v7 = vadd.f32 %v1494_v14, %v1323_v50  ;;  %v1335_v1 = vpop.f32.mrf.mxu1  ;;  %v1696_v55 = vadd.f32 %v4512_v3, %v1657_v13 }
 0x1bd   : > { %v1336_v8 = vadd.f32 %v1335_v1, %v1164_v2  ;;  %v3590_v16 = vpop.f32.mrf.mxu0  ;;  %v1730_v2 = vmax.f32 %v1698_v37, 0.0 }
 0x1be   : > { %v1699_v58 = vadd.f32 %v4512_v3, %v1660_v59  ;;  %v1658_v38 = vmul.f32 %v4506_v29, %v1619_v7  ;;  %v1624_v25 = vadd.f32 %v3590_v16, %v1344_v56  ;;  %v3557_v27 = vpop.f32.mrf.mxu1  ;;  %v1728_v1 = vmax.f32 %v1696_v55, 0.0 }
 0x1bf   : > { %v1347_v47 = vadd.f32 %v3557_v27, %v4453_v23  ;;  %v1507_v15 = vpop.f32.mrf.mxu0 }
 0x1c0   : > { %v1731_v32 = vmax.f32 %v1699_v58, 0.0  ;;  %v1697_v46 = vadd.f32 %v4512_v3, %v1658_v38  ;;  %v1663_v50 = vmul.f32 %v4506_v29, %v1624_v25  ;;  %v1622_v53 = vadd.f32 %v1507_v15, %v1336_v8  ;;  %v1338_v52 = vpop.f32.mrf.mxu1 }
 0x1c1   : > { %v1339_v14 = vadd.f32 %v1338_v52, %v4457_v19  ;;  %v3591_v13 = vpop.f32.mrf.mxu0 }
 0x1c2   : > { %v1729_v59 = vmax.f32 %v1697_v46, 0.0  ;;  %v3560_v4 = vpop.f32.mrf.mxu1  ;;  %v4524_v7 = vpack.c.bf16 %v1731_v32, %v1730_v2  ;;  %v1625_v56 = vadd.f32 %v3591_v13, %v1347_v47  ;;  %v1702_v38 = vadd.f32 %v4512_v3, %v1663_v50 }
 0x1c3   : > { %v1360_v23 = vadd.f32 %v3560_v4, %v4461_v62  ;;  %v1510_v16 = vpop.f32.mrf.mxu0  ;;  %v1661_v25 = vmul.f32 %v4506_v29, %v1622_v53 }
 0x1c4   : > { %v1760_v58 = vpack.c.bf16 %v1729_v59, %v1728_v1  ;;  %v1351_v8 = vpop.f32.mrf.mxu1  ;;  %v1664_v37 = vmul.f32 %v4506_v29, %v1625_v56  ;;  %v1623_v27 = vadd.f32 %v1510_v16, %v1339_v14  ;;  %v1784_v47 = vshrl.u32 %v4524_v7, 16 }
 0x1c5   : > { %v1352_v19 = vadd.f32 %v1351_v8, %v4465_v26  ;;  %v3594_v55 = vpop.f32.mrf.mxu0  ;;  %v1734_v53 = vmax.f32 %v1702_v38, 0.0  ;;  %v1700_v2 = vadd.f32 %v4512_v3, %v1661_v25 }
 0x1c6   : > { %v1777_v15 = vshrl.u32 %v1760_v58, 16  ;;  %v1628_v46 = vadd.f32 %v3594_v55, %v1360_v23  ;;  %v3561_v32 = vpop.f32.mrf.mxu1  ;;  %v1703_v4 = vadd.f32 %v4512_v3, %v1664_v37  ;;  %v1662_v62 = vmul.f32 %v4506_v29, %v1623_v27 }
 0x1c7   : > { %v1363_v50 = vadd.f32 %v3561_v32, %v4469_v33  ;;  %v1523_v52 = vpop.f32.mrf.mxu0  ;;  %v1780_v8 = vshll.u32 %v1760_v58, 16  ;;  %v1786_v32 = vrot.slane %v1784_v47, 7 }
 0x1c8   : > { %v1667_v14 = vmul.f32 %v4506_v29, %v1628_v46  ;;  %v1626_v13 = vadd.f32 %v1523_v52, %v1352_v19  ;;  %v1354_v26 = vpop.f32.mrf.mxu1  ;;  %v1735_v1 = vmax.f32 %v1703_v4, 0.0  ;;  %v1701_v59 = vadd.f32 %v4512_v3, %v1662_v62 }
 0x1c9   : > { %v1355_v56 = vadd.f32 %v1354_v26, %v4473_v41  ;;  %v3595_v23 = vpop.f32.mrf.mxu0  ;;  %v1779_v16 = vrot.slane %v1777_v15, 7  ;;  %v1732_v4 = vmax.f32 %v1700_v2, 0.0  ;;  %v1787_v2 = vshll.u32 %v4524_v7, 16 }
 0x1ca   : > { %v1665_v37 = vmul.f32 %v4506_v29, %v1626_v13  ;;  %v1629_v27 = vadd.f32 %v3595_v23, %v1363_v50  ;;  %v3564_v33 = vpop.f32.mrf.mxu1  ;;  %v1763_v55 = vpack.c.bf16 %v1735_v1, %v1734_v53  ;;  %v1733_v38 = vmax.f32 %v1701_v59, 0.0 }
 0x1cb   : > { %v1706_v25 = vadd.f32 %v4512_v3, %v1667_v14  ;;  %v1376_v46 = vadd.f32 %v3564_v33, %v4480_v31  ;;  %v1526_v19 = vpop.f32.mrf.mxu0  ;;  %v1782_v13 = vor.u32 %v1780_v8, %v1779_v16 }
 0x1cc   : > { %v1668_v62 = vmul.f32 %v4506_v29, %v1629_v27  ;;  %v1627_v52 = vadd.f32 %v1526_v19, %v1355_v56  ;;  %v1367_v41 = vpop.f32.mrf.mxu1  ;;  %v1798_v26 = vshrl.u32 %v1763_v55, 16  ;;  %v1704_v58 = vadd.f32 %v4512_v3, %v1665_v37 }
 0x1cd   : > { %v1368_v15 = vadd.f32 %v1367_v41, %v4487_v42  ;;  %v3598_v50 = vpop.f32.mrf.mxu0  ;;  %v4545_v53 = vpack.c.bf16 %v1733_v38, %v1732_v4  ;;  %v1738_v59 = vmax.f32 %v1706_v25, 0.0  ;;  %v4553_v37 = vsel %vm3917_vm3, %v1779_v16, 0 }
 0x1ce   : > { %v1707_v14 = vadd.f32 %v4512_v3, %v1668_v62  ;;  %v1666_v31 = vmul.f32 %v4506_v29, %v1627_v52  ;;  %v1632_v1 = vadd.f32 %v3598_v50, %v1376_v46  ;;  %v3565_v47 = vpop.f32.mrf.mxu1  ;;  %v1789_v19 = vor.u32 %v1787_v2, %v1786_v32 }
 0x1cf   : > { %v1379_v56 = vadd.f32 %v3565_v47, %v4493_v11  ;;  %v1539_v23 = vpop.f32.mrf.mxu0  ;;  %v1736_v46 = vmax.f32 %v1704_v58, 0.0  ;;  %v4559_v7 = vsel %vm3917_vm3, 0, %v1782_v13  ;;  %v4563_v11 = vsel %vm3917_vm3, %v1786_v32, 0 }
 0x1d0   : > { %v1739_v42 = vmax.f32 %v1707_v14, 0.0  ;;  %v1705_v8 = vadd.f32 %v4512_v3, %v1666_v31  ;;  %v1671_v27 = vmul.f32 %v4506_v29, %v1632_v1  ;;  %v1630_v33 = vadd.f32 %v1539_v23, %v1368_v15  ;;  %v1370_v38 = vpop.f32.mrf.mxu1 }
 0x1d1   : > { %v3599_v25 = vpop.f32.mrf.mxu0  ;;  %v4565_v16 = vrot.slane %v1798_v26, 7  ;;  %v1791_v4 = vshrl.u32 %v4545_v53, 16  ;;  %v2194_v58 = vrot.slane %v4559_v7, 1  ;;  %v2195_v50 = vrot.slane %v4553_v37, 1 }
 0x1d2   : > { %v4568_v62 = vpack.c.bf16 %v1739_v42, %v1738_v59  ;;  %v1737_v52 = vmax.f32 %v1705_v8, 0.0  ;;  %v3568_v41 = vpop.f32.mrf.mxu1  ;;  %v1710_v15 = vadd.f32 %v4512_v3, %v1671_v27  ;;  %v1633_v13 = vadd.f32 %v3599_v25, %v1379_v56 }
 0x1d3   : > { %v1542_v14 = vpop.f32.mrf.mxu0  ;;  %v1801_v31 = vshll.u32 %v1763_v55, 16  ;;  %v1669_v32 = vmul.f32 %v4506_v29, %v1630_v33  ;;  %v1371_v26 = vadd.f32 %v1370_v38, %v4501_v12  ;;  %v2196_v2 = vsel %vm896_vm2, %v2194_v58, %v2195_v50 }
 0x1d4   : > { %v4573_v1 = vpack.c.bf16 %v1737_v52, %v1736_v46  ;;  %v1383_v47 = vpop.f32.mrf.mxu1  ;;  %v1672_v59 = vmul.f32 %v4506_v29, %v1633_v13  ;;  %v4581_v23 = vsel %vm3917_vm3, 0, %v1789_v19  ;;  %v4584_v8 = vrot.slane %v1791_v4, 7  ;;  %2241 = vrot.lane.b32.xlu0 %v2196_v2, %s3800_s17 }
 0x1d5   : > { %v3602_v42 = vpop.f32.mrf.mxu0  ;;  %v1803_v56 = vor.u32 %v1801_v31, %v4565_v16  ;;  %v1794_v55 = vshll.u32 %v4545_v53, 16  ;;  %v1812_v27 = vshrl.u32 %v4568_v62, 16  ;;  %v1742_v33 = vmax.f32 %v1710_v15, 0.0 }
 0x1d6   : > { %v3569_v12 = vpop.f32.mrf.mxu1  ;;  %v1711_v38 = vadd.f32 %v4512_v3, %v1672_v59  ;;  %v1967_v46 = vshll.u32 %v4581_v23, 16  ;;  %v1972_v19 = vshll.u32 %v4563_v11, 16  ;;  %v1805_v52 = vshrl.u32 %v4573_v1, 16 }
 0x1d7   : > { %v1555_v25 = vpop.f32.mrf.mxu0  ;;  %v1708_v4 = vadd.f32 %v4512_v3, %v1669_v32  ;;  %v1392_v53 = vadd.f32 %v3568_v41, %v4435_v44  ;;  %v1631_v58 = vadd.f32 %v1542_v14, %v1371_v26  ;;  %v1965_v31 = vshrl.u32 %v4581_v23, 16 }
 0x1d8   : > { %v1386_v50 = vpop.f32.mrf.mxu1  ;;  %v1743_v13 = vmax.f32 %v1711_v38, 0.0  ;;  %v1969_v2 = vrot.slane %v1967_v46, 1  ;;  %v1384_v15 = vadd.f32 %v1383_v47, %v4437_v36  ;;  %v4602_v35 = vrot.slane %v1812_v27, 7 }
 0x1d9   : > { %v3603_v59 = vpop.f32.mrf.mxu0  ;;  %v1974_v39 = vrot.slane %v1972_v19, 1  ;;  %v1670_v32 = vmul.f32 %v4506_v29, %v1631_v58  ;;  %v1955_v44 = vshll.u32 %v4559_v7, 16  ;;  %v1960_v38 = vshll.u32 %v4553_v37, 16 }
 0x1da   : > { %v3572_v41 = vpop.f32.mrf.mxu1  ;;  %v4606_v14 = vpack.c.bf16 %v1743_v13, %v1742_v33  ;;  %v1970_v26 = vor.u32 %v1969_v2, %v1965_v31  ;;  %v1636_v36 = vadd.f32 %v3602_v42, %v1392_v53  ;;  %v1953_v27 = vshrl.u32 %v4559_v7, 16 }
 0x1db   : > { %v1558_v47 = vpop.f32.mrf.mxu0  ;;  %v1709_v46 = vadd.f32 %v4512_v3, %v1670_v32  ;;  %v1957_v19 = vrot.slane %v1955_v44, 1  ;;  %v1634_v61 = vadd.f32 %v1555_v25, %v1384_v15  ;;  %v4613_v58 = vrot.slane %v1805_v52, 7 }
 0x1dc   : > { %v1826_v9 = vshrl.u32 %v4606_v14, 16  ;;  %v1975_v33 = vsel %vm644_vm4, %v1970_v26, %v1974_v39  ;;  %v1395_v13 = vadd.f32 %v3569_v12, %v4439_v0  ;;  %v4618_v37 = vpop.f32.mrf.mxu1  ;;  %v1962_v2 = vrot.slane %v1960_v38, 1 }
 0x1dd   : > { %v3606_v42 = vpop.f32.mrf.mxu0  ;;  %2136 = vrot.lane.b32.xlu1 %v1975_v33, %s3797_s15  ;;  %v1741_v53 = vmax.f32 %v1709_v46, 0.0  ;;  %v1958_v31 = vor.u32 %v1957_v19, %v1953_v27  ;;  %v1675_v32 = vmul.f32 %v4506_v29, %v1636_v36  ;;  %v1796_v25 = vor.u32 %v1794_v55, %v4584_v8 }
 0x1de   : > { %v1815_v52 = vshll.u32 %v4568_v62, 16  ;;  %v1808_v15 = vshll.u32 %v4573_v1, 16  ;;  %v1673_v39 = vmul.f32 %v4506_v29, %v1634_v61  ;;  %v1740_v44 = vmax.f32 %v1708_v4, 0.0  ;;  %v3573_v61 = vpop.f32.mrf.mxu1 }
 0x1df   : > { %v1963_v0 = vsel %vm644_vm4, %v1958_v31, %v1962_v2  ;;  %v1387_v12 = vadd.f32 %v1386_v50, %v4441_v51  ;;  %v2197_v26 = vrot.slane %v4581_v23, 1  ;;  %v1637_v62 = vadd.f32 %v3603_v59, %v1395_v13  ;;  %v1571_v55 = vpop.f32.mrf.mxu0 }
 0x1e0   : > { %v4630_v46 = vor.u32 %v1815_v52, %v4602_v35  ;;  %v4633_v38 = vor.u32 %v1808_v15, %v4613_v58  ;;  %2134 = vrot.lane.b32.xlu0 %v1963_v0, %s3797_s15  ;;  %v4638_v1 = vsel %vm3917_vm3, 0, %v1803_v56  ;;  %v4640_v4 = vrot.slane %v1826_v9, 7 }
 0x1e1   : > { %v4642_v51 = vpack.c.bf16 %v1741_v53, %v1740_v44  ;;  %v1714_v50 = vadd.f32 %v4512_v3, %v1675_v32  ;;  %2239 = vrot.lane.b32.xlu1 %v4284_v17, %s3800_s17  ;;  %v2198_v36 = vrot.slane %v4563_v11, 1  ;;  %v1712_v27 = vadd.f32 %v4512_v3, %v1673_v39  ;;  %v3607_v32 = vpop.f32.mrf.mxu0 }
 0x1e2   : > { %v1676_v59 = vmul.f32 %v4506_v29, %v1637_v62  ;;  %v1939_v56 = vsel %vm3917_vm3, %v4565_v16, 0  ;;  %v1991_v9 = vshll.u32 %v4638_v1, 16  ;;  %v1408_v13 = vadd.f32 %v3572_v41, %v4443_v57  ;;  %v1402_v16 = vpop.f32.mrf.mxu1 }
 0x1e3   : > { %v2199_v19 = vsel %vm896_vm2, %v2197_v26, %v2198_v36  ;;  %v1996_v33 = vshll.u32 %v1939_v56, 16  ;;  %v1635_v53 = vadd.f32 %v1558_v47, %v1387_v12  ;;  %v1989_v11 = vshrl.u32 %v4638_v1, 16 }
 0x1e4   : > { %2243 = vrot.lane.b32.xlu0 %v2199_v19, %s3800_s17  ;;  %v1715_v17 = vadd.f32 %v4512_v3, %v1676_v59  ;;  %v1993_v31 = vrot.slane %v1991_v9, 1  ;;  %v4661_v2 = vsel %vm3917_vm3, 0, %v1796_v25  ;;  %v1819_v52 = vshrl.u32 %v4642_v51, 16  ;;  %v3576_v19 = vpop.f32.mrf.mxu1 }
 0x1e5   : > { %v1746_v15 = vmax.f32 %v1714_v50, 0.0  ;;  %v1674_v39 = vmul.f32 %v4506_v29, %v1635_v53  ;;  %v1938_v57 = vsel %vm3917_vm3, %v4584_v8, 0  ;;  %v1998_v44 = vrot.slane %v1996_v33, 1  ;;  %v1574_v8 = vpop.f32.mrf.mxu0 }
 0x1e6   : > { %v1747_v41 = vmax.f32 %v1715_v17, 0.0  ;;  %v1994_v47 = vor.u32 %v1993_v31, %v1989_v11  ;;  %v1979_v0 = vshll.u32 %v4661_v2, 16  ;;  %v1977_v25 = vshrl.u32 %v4661_v2, 16 }
 0x1e7   : > { %v1713_v12 = vadd.f32 %v4512_v3, %v1674_v39  ;;  %v1984_v26 = vshll.u32 %v1938_v57, 16  ;;  %v1640_v62 = vadd.f32 %v3606_v42, %v1408_v13  ;;  %v2203_v9 = vrot.slane %v4638_v1, 1 }
 0x1e8   : > { %v4671_v36 = vpack.c.bf16 %v1747_v41, %v1746_v15  ;;  %v1999_v50 = vsel %vm644_vm4, %v1994_v47, %v1998_v44  ;;  %v1981_v59 = vrot.slane %v1979_v0, 1  ;;  %v1829_v53 = vshll.u32 %v4606_v14, 16 }
 0x1e9   : > { %v4676_v33 = vrot.slane %v1819_v52, 7  ;;  %2140 = vrot.lane.b32.xlu1 %v1999_v50, %s3797_s15  ;;  %v1745_v17 = vmax.f32 %v1713_v12, 0.0  ;;  %v1400_v11 = vadd.f32 %v4618_v37, %v4445_v10  ;;  %v1986_v13 = vrot.slane %v1984_v26, 1  ;;  %v1415_v37 = vpop.f32.mrf.mxu1 }
 0x1ea   : > { %v1982_v42 = vor.u32 %v1981_v59, %v1977_v25  ;;  %v2204_v31 = vrot.slane %v1939_v56, 1  ;;  %v1411_v15 = vadd.f32 %v3573_v61, %v4447_v60  ;;  %v4683_v39 = vor.u32 %v1829_v53, %v4640_v4  ;;  %v3610_v56 = vpop.f32.mrf.mxu0 }
 0x1eb   : > { %v1744_v41 = vmax.f32 %v1712_v27, 0.0  ;;  %v1840_v47 = vshrl.u32 %v4671_v36, 16  ;;  %v1679_v14 = vmul.f32 %v4506_v29, %v1640_v62  ;;  %v1822_v52 = vshll.u32 %v4642_v51, 16 }
 0x1ec   : > { %v1987_v44 = vsel %vm644_vm4, %v1982_v42, %v1986_v13  ;;  %v2205_v0 = vsel %vm896_vm2, %v2203_v9, %v2204_v31  ;;  %v2200_v10 = vrot.slane %v4661_v2, 1  ;;  %v1638_v60 = vadd.f32 %v1571_v55, %v1400_v11  ;;  %v3577_v9 = vpop.f32.mrf.mxu1 }
 0x1ed   : > { %v4691_v12 = vpack.c.bf16 %v1745_v17, %v1744_v41  ;;  %2138 = vrot.lane.b32.xlu0 %v1987_v44, %s3797_s15  ;;  %2247 = vrot.lane.b32.xlu1 %v2205_v0, %s3800_s17  ;;  %v1403_v61 = vadd.f32 %v1402_v16, %v4449_v20  ;;  %v2201_v27 = vrot.slane %v1938_v57, 1  ;;  %v4697_v51 = vor.u32 %v1822_v52, %v4676_v33 }
 0x1ee   : > { %v1843_v25 = vshll.u32 %v4671_v36, 16  ;;  %v1641_v26 = vadd.f32 %v3607_v32, %v1411_v15  ;;  %v4703_v62 = vsel %vm3917_vm3, 0, %v4630_v46  ;;  %v4705_v50 = vrot.slane %v1840_v47, 7  ;;  %v1587_v46 = vpop.f32.mrf.mxu0  ;;  %v1418_v0 = vpop.f32.mrf.mxu1 }
 0x1ef   : > { %v1718_v59 = vadd.f32 %v4512_v3, %v1679_v14  ;;  %v2202_v55 = vsel %vm896_vm2, %v2200_v10, %v2201_v27  ;;  %v1941_v20 = vsel %vm3917_vm3, %v4602_v35, 0  ;;  %v2015_v57 = vshll.u32 %v4703_v62, 16 }
 0x1f0   : > { %v1680_v16 = vmul.f32 %v4506_v29, %v1641_v26  ;;  %v2020_v32 = vshll.u32 %v1941_v20, 16  ;;  %v1424_v36 = vadd.f32 %v3576_v19, %v4451_v22  ;;  %v1833_v53 = vshrl.u32 %v4691_v12, 16 }
 0x1f1   : > { %v1677_v17 = vmul.f32 %v4506_v29, %v1638_v60  ;;  %2245 = vrot.lane.b32.xlu0 %v2202_v55, %s3800_s17  ;;  %v2013_v11 = vshrl.u32 %v4703_v62, 16  ;;  %v1639_v42 = vadd.f32 %v1574_v8, %v1403_v61  ;;  %v2017_v13 = vrot.slane %v2015_v57, 1 }
 0x1f2   : > { %v1719_v35 = vadd.f32 %v4512_v3, %v1680_v16  ;;  %v1416_v31 = vadd.f32 %v1415_v37, %v4455_v5  ;;  %v4724_v22 = vsel %vm3917_vm3, 0, %v4633_v38  ;;  %v2022_v19 = vrot.slane %v2020_v32, 1  ;;  %v3611_v5 = vpop.f32.mrf.mxu0 }
 0x1f3   : > { %v1678_v15 = vmul.f32 %v4506_v29, %v1639_v42  ;;  %v1940_v41 = vsel %vm3917_vm3, %v4613_v58, 0  ;;  %v2003_v47 = vshll.u32 %v4724_v22, 16  ;;  %v2018_v14 = vor.u32 %v2017_v13, %v2013_v11 }
 0x1f4   : > { %v1751_v8 = vmax.f32 %v1719_v35, 0.0  ;;  %v2008_v52 = vshll.u32 %v1940_v41, 16  ;;  %v1644_v44 = vadd.f32 %v3610_v56, %v1424_v36  ;;  %v1716_v10 = vadd.f32 %v4512_v3, %v1677_v17  ;;  %v1590_v42 = vpop.f32.mrf.mxu0 }
 0x1f5   : > { %v1717_v38 = vadd.f32 %v4512_v3, %v1678_v15  ;;  %v2001_v37 = vshrl.u32 %v4724_v22, 16  ;;  %v2005_v60 = vrot.slane %v2003_v47, 1  ;;  %v1750_v61 = vmax.f32 %v1718_v59, 0.0  ;;  %v3580_v59 = vpop.f32.mrf.mxu1 }
 0x1f6   : > { %v2023_v27 = vsel %vm644_vm4, %v2018_v14, %v2022_v19  ;;  %v1683_v58 = vmul.f32 %v4506_v29, %v1644_v44  ;;  %v2209_v26 = vrot.slane %v4703_v62, 1  ;;  %v2010_v16 = vrot.slane %v2008_v52, 1  ;;  %v3614_v44 = vpop.f32.mrf.mxu0 }
 0x1f7   : > { %2144 = vrot.lane.b32.xlu1 %v2023_v27, %s3797_s15  ;;  %v1749_v55 = vmax.f32 %v1717_v38, 0.0  ;;  %v2006_v56 = vor.u32 %v2005_v60, %v2001_v37  ;;  %v1427_v57 = vadd.f32 %v3577_v9, %v4459_v24  ;;  %v4739_v32 = vrot.slane %v1833_v53, 7  ;;  %v1431_v52 = vpop.f32.mrf.mxu1 }
 0x1f8   : > { %v4741_v36 = vpack.c.bf16 %v1751_v8, %v1750_v61  ;;  %v2210_v17 = vrot.slane %v1941_v20, 1  ;;  %v1642_v11 = vadd.f32 %v1587_v46, %v1416_v31  ;;  %v1836_v35 = vshll.u32 %v4691_v12, 16 }
 0x1f9   : > { %v1748_v13 = vmax.f32 %v1716_v10, 0.0  ;;  %v2011_v19 = vsel %vm644_vm4, %v2006_v56, %v2010_v16  ;;  %v2206_v15 = vrot.slane %v4724_v22, 1  ;;  %v4747_v47 = vor.u32 %v1843_v25, %v4705_v50  ;;  %v3581_v16 = vpop.f32.mrf.mxu1 }
 0x1fa   : > { %2142 = vrot.lane.b32.xlu0 %v2011_v19, %s3797_s15  ;;  %v1722_v24 = vadd.f32 %v4512_v3, %v1683_v58  ;;  %v2211_v9 = vsel %vm896_vm2, %v2209_v26, %v2210_v17  ;;  %v1419_v20 = vadd.f32 %v1418_v0, %v4463_v63  ;;  %v2207_v12 = vrot.slane %v1940_v41, 1 }
 0x1fb   : > { %v4753_v46 = vpack.c.bf16 %v1749_v55, %v1748_v13  ;;  %2251 = vrot.lane.b32.xlu1 %v2211_v9, %s3800_s17  ;;  %v1645_v53 = vadd.f32 %v3611_v5, %v1427_v57  ;;  %v4759_v31 = vsel %vm3917_vm3, 0, %v4683_v39  ;;  %v4762_v25 = vor.u32 %v1836_v35, %v4739_v32  ;;  %v1603_v57 = vpop.f32.mrf.mxu0 }
 0x1fc   : > { %v1854_v8 = vshrl.u32 %v4741_v36, 16  ;;  %v1681_v14 = vmul.f32 %v4506_v29, %v1642_v11  ;;  %v1943_v63 = vsel %vm3917_vm3, %v4640_v4, 0  ;;  %v1857_v41 = vshll.u32 %v4741_v36, 16 }
 0x1fd   : > { %v2208_v0 = vsel %vm896_vm2, %v2206_v15, %v2207_v12  ;;  %v1684_v39 = vmul.f32 %v4506_v29, %v1645_v53  ;;  %v2039_v5 = vshll.u32 %v4759_v31, 16  ;;  %v1754_v10 = vmax.f32 %v1722_v24, 0.0 }
 0x1fe   : > { %2249 = vrot.lane.b32.xlu0 %v2208_v0, %s3800_s17  ;;  %v2044_v38 = vshll.u32 %v1943_v63, 16  ;;  %v1440_v37 = vadd.f32 %v3580_v59, %v4467_v28  ;;  %v1643_v60 = vadd.f32 %v1590_v42, %v1419_v20  ;;  %v1847_v61 = vshrl.u32 %v4753_v46, 16  ;;  %v3615_v0 = vpop.f32.mrf.mxu0 }
 0x1ff   : > { %v1723_v4 = vadd.f32 %v4512_v3, %v1684_v39  ;;  %v2037_v27 = vshrl.u32 %v4759_v31, 16  ;;  %v2041_v58 = vrot.slane %v2039_v5, 1  ;;  %v1720_v26 = vadd.f32 %v4512_v3, %v1681_v14  ;;  %v1434_v14 = vpop.f32.mrf.mxu1 }
 0x200   : > { %v1682_v55 = vmul.f32 %v4506_v29, %v1643_v60  ;;  %v4783_v56 = vsel %vm3917_vm3, 0, %v4697_v51  ;;  %v1942_v28 = vsel %vm3917_vm3, %v4676_v33, 0  ;;  %v2046_v11 = vrot.slane %v2044_v38, 1 }
 0x201   : > { %v1755_v36 = vmax.f32 %v1723_v4, 0.0  ;;  %v2042_v17 = vor.u32 %v2041_v58, %v2037_v27  ;;  %v2027_v59 = vshll.u32 %v4783_v56, 16  ;;  %v1432_v35 = vadd.f32 %v1431_v52, %v4471_v34 }
 0x202   : > { %v1721_v42 = vadd.f32 %v4512_v3, %v1682_v55  ;;  %v2032_v13 = vshll.u32 %v1942_v28, 16  ;;  %v1648_v19 = vadd.f32 %v3614_v44, %v1440_v37  ;;  %v2025_v15 = vshrl.u32 %v4783_v56, 16 }
 0x203   : > { %v2047_v51 = vsel %vm644_vm4, %v2042_v17, %v2046_v11  ;;  %v2029_v24 = vrot.slane %v2027_v59, 1  ;;  %v2215_v33 = vrot.slane %v4759_v31, 1  ;;  %v4794_v9 = vrot.slane %v1854_v8, 7 }
 0x204   : > { %v4796_v20 = vrot.slane %v1847_v61, 7  ;;  %v1773_v12 = vpack.c.bf16 %v1755_v36, %v1754_v10  ;;  %2148 = vrot.lane.b32.xlu1 %v2047_v51, %s3797_s15  ;;  %v1753_v53 = vmax.f32 %v1721_v42, 0.0  ;;  %v2034_v52 = vrot.slane %v2032_v13, 1 }
 0x205   : > { %v2030_v34 = vor.u32 %v2029_v24, %v2025_v15  ;;  %v2216_v44 = vrot.slane %v1943_v63, 1  ;;  %v1443_v39 = vadd.f32 %v3581_v16, %v4475_v6  ;;  %v1850_v5 = vshll.u32 %v4753_v46, 16  ;;  %v1606_v46 = vpop.f32.mrf.mxu0 }
 0x206   : > { %v1752_v38 = vmax.f32 %v1720_v26, 0.0  ;;  %v1687_v37 = vmul.f32 %v4506_v29, %v1648_v19  ;;  %v1646_v8 = vadd.f32 %v1603_v57, %v1432_v35  ;;  %v1435_v61 = vadd.f32 %v1434_v14, %v4489_v45 }
 0x207   : > { %v2035_v60 = vsel %vm644_vm4, %v2030_v34, %v2034_v52  ;;  %v2217_v10 = vsel %vm896_vm2, %v2215_v33, %v2216_v44  ;;  %v2212_v4 = vrot.slane %v4783_v56, 1  ;;  %v1859_v27 = vor.u32 %v1857_v41, %v4794_v9 }
 0x208   : > { %v1868_v58 = vshrl.u32 %v1773_v12, 16  ;;  %v4807_v63 = vpack.c.bf16 %v1753_v53, %v1752_v38  ;;  %2146 = vrot.lane.b32.xlu0 %v2035_v60, %s3797_s15  ;;  %2255 = vrot.lane.b32.xlu1 %v2217_v10, %s3800_s17  ;;  %v2213_v6 = vrot.slane %v1942_v28, 1  ;;  %v1852_v26 = vor.u32 %v1850_v5, %v4796_v20 }
 0x209   : > { %v1871_v55 = vshll.u32 %v1773_v12, 16  ;;  %v1649_v16 = vadd.f32 %v3615_v0, %v1443_v39  ;;  %v4815_v45 = vsel %vm3917_vm3, 0, %v4747_v47  ;;  %v1726_v41 = vadd.f32 %v4512_v3, %v1687_v37 }
 0x20a   : > { %v1685_v57 = vmul.f32 %v4506_v29, %v1646_v8  ;;  %v2214_v36 = vsel %vm896_vm2, %v2212_v4, %v2213_v6  ;;  %v1945_v28 = vsel %vm3917_vm3, %v4705_v50, 0  ;;  %v2063_v11 = vshll.u32 %v4815_v45, 16 }
 0x20b   : > { %v1688_v17 = vmul.f32 %v4506_v29, %v1649_v16  ;;  %v2068_v59 = vshll.u32 %v1945_v28, 16  ;;  %v1647_v42 = vadd.f32 %v1606_v46, %v1435_v61  ;;  %v1870_v35 = vrot.slane %v1868_v58, 7 }
 0x20c   : > { %v1861_v47 = vshrl.u32 %v4807_v63, 16  ;;  %2253 = vrot.lane.b32.xlu0 %v2214_v36, %s3800_s17  ;;  %v4830_v13 = vsel %vm3917_vm3, 0, %v4762_v25  ;;  %v1944_v50 = vsel %vm3917_vm3, %v4739_v32, 0  ;;  %v2061_v51 = vshrl.u32 %v4815_v45, 16 }
 0x20d   : > { %v1727_v19 = vadd.f32 %v4512_v3, %v1688_v17  ;;  %v2065_v15 = vrot.slane %v2063_v11, 1  ;;  %v1686_v24 = vmul.f32 %v4506_v29, %v1647_v42  ;;  %v1864_v33 = vshll.u32 %v4807_v63, 16 }
 0x20e   : > { %v1724_v12 = vadd.f32 %v4512_v3, %v1685_v57  ;;  %v2051_v53 = vshll.u32 %v4830_v13, 16  ;;  %v2056_v14 = vshll.u32 %v1944_v50, 16  ;;  %v2070_v34 = vrot.slane %v2068_v59, 1 }
 0x20f   : > { %v1759_v25 = vmax.f32 %v1727_v19, 0.0  ;;  %v2066_v0 = vor.u32 %v2065_v15, %v2061_v51  ;;  %v1725_v52 = vadd.f32 %v4512_v3, %v1686_v24  ;;  %v1873_v32 = vor.u32 %v1871_v55, %v1870_v35 }
 0x210   : > { %v1758_v44 = vmax.f32 %v1726_v41, 0.0  ;;  %v2049_v39 = vshrl.u32 %v4830_v13, 16  ;;  %v2053_v5 = vrot.slane %v2051_v53, 1  ;;  %v1863_v38 = vrot.slane %v1861_v47, 7 }
 0x211   : > { %v2071_v29 = vsel %vm644_vm4, %v2066_v0, %v2070_v34  ;;  %v1757_v37 = vmax.f32 %v1725_v52, 0.0  ;;  %v2221_v8 = vrot.slane %v4815_v45, 1  ;;  %v2058_v10 = vrot.slane %v2056_v14, 1 }
 0x212   : > { %2152 = vrot.lane.b32.xlu1 %v2071_v29, %s3797_s15  ;;  %v2054_v60 = vor.u32 %v2053_v5, %v2049_v39  ;;  %v4848_v61 = vsel %vm3917_vm3, 0, %v1859_v27  ;;  %v1947_v3 = vsel %vm3917_vm3, %v4794_v9, 0  ;;  %v1756_v4 = vmax.f32 %v1724_v12, 0.0 }
 0x213   : > { %v4853_v58 = vpack.c.bf16 %v1759_v25, %v1758_v44  ;;  %v2222_v63 = vrot.slane %v1945_v28, 1  ;;  %v2218_v6 = vrot.slane %v4830_v13, 1  ;;  %v2087_v55 = vshll.u32 %v4848_v61, 16 }
 0x214   : > { %v2059_v46 = vsel %vm644_vm4, %v2054_v60, %v2058_v10  ;;  %v2092_v16 = vshll.u32 %v1947_v3, 16  ;;  %v4860_v41 = vsel %vm3917_vm3, 0, %v1852_v26  ;;  %v1774_v27 = vpack.c.bf16 %v1757_v37, %v1756_v4 }
 0x215   : > { %2150 = vrot.lane.b32.xlu0 %v2059_v46, %s3797_s15  ;;  %v2223_v9 = vsel %vm896_vm2, %v2221_v8, %v2222_v63  ;;  %v2219_v57 = vrot.slane %v1944_v50, 1  ;;  %v1946_v36 = vsel %vm3917_vm3, %v4796_v20, 0  ;;  %v2085_v28 = vshrl.u32 %v4848_v61, 16 }
 0x216   : > { %2259 = vrot.lane.b32.xlu1 %v2223_v9, %s3800_s17  ;;  %v2089_v17 = vrot.slane %v2087_v55, 1  ;;  %v2075_v11 = vshll.u32 %v4860_v41, 16  ;;  %v2080_v59 = vshll.u32 %v1946_v36, 16  ;;  %v1866_v26 = vor.u32 %v1864_v33, %v1863_v38 }
 0x217   : > { %v1882_v42 = vshrl.u32 %v4853_v58, 16  ;;  %v2220_v47 = vsel %vm896_vm2, %v2218_v6, %v2219_v57  ;;  %v2073_v19 = vshrl.u32 %v4860_v41, 16  ;;  %v2094_v51 = vrot.slane %v2092_v16, 1 }
 0x218   : > { %v2090_v50 = vor.u32 %v2089_v17, %v2085_v28  ;;  %v2077_v15 = vrot.slane %v2075_v11, 1  ;;  %v4875_v20 = vsel %vm3917_vm3, 0, %v1873_v32  ;;  %v1875_v24 = vshrl.u32 %v1774_v27, 16  ;;  %v2959_v28 = vld [vmem:[%s5389_s7] sm:$0x3] }
 0x219   : > { %2257 = vrot.lane.b32.xlu0 %v2220_v47, %s3800_s17  ;;  %v2082_v12 = vrot.slane %v2080_v59, 1  ;;  %v2227_v53 = vrot.slane %v4848_v61, 1  ;;  %v1949_v33 = vsel %vm3917_vm3, %v1870_v35, 0  ;;  %v2111_v0 = vshll.u32 %v4875_v20, 16  ;;  %3767 = vmatprep.subr.msk.bf16.mxu0 %vm2992_vm10, %v2959_v28 }
 0x21a   : > { %v2095_v14 = vsel %vm644_vm4, %v2090_v50, %v2094_v51  ;;  %v2078_v25 = vor.u32 %v2077_v15, %v2073_v19  ;;  %v2116_v34 = vshll.u32 %v1949_v33, 16  ;;  %v1878_v52 = vshll.u32 %v1774_v27, 16 }
 0x21b   : > { %2156 = vrot.lane.b32.xlu1 %v2095_v14, %s3797_s15  ;;  %v2228_v32 = vrot.slane %v1947_v3, 1  ;;  %v4886_v44 = vsel %vm3917_vm3, 0, %v1866_v26  ;;  %v1948_v39 = vsel %vm3917_vm3, %v1863_v38, 0  ;;  %v2224_v35 = vrot.slane %v4860_v41, 1 }
 0x21c   : > { %v2083_v5 = vsel %vm644_vm4, %v2078_v25, %v2082_v12  ;;  %v2109_v29 = vshrl.u32 %v4875_v20, 16  ;;  %v2113_v37 = vrot.slane %v2111_v0, 1  ;;  %v2225_v60 = vrot.slane %v1946_v36, 1 }
 0x21d   : > { %2154 = vrot.lane.b32.xlu0 %v2083_v5, %s3797_s15  ;;  %v2229_v8 = vsel %vm896_vm2, %v2227_v53, %v2228_v32  ;;  %v2099_v10 = vshll.u32 %v4886_v44, 16  ;;  %v2104_v3 = vshll.u32 %v1948_v39, 16  ;;  %v2118_v63 = vrot.slane %v2116_v34, 1 }
 0x21e   : > { %v2114_v4 = vor.u32 %v2113_v37, %v2109_v29  ;;  %v1877_v6 = vrot.slane %v1875_v24, 7  ;;  %v1884_v46 = vrot.slane %v1882_v42, 7  ;;  %v1885_v38 = vshll.u32 %v4853_v58, 16 }
 0x21f   : > { %2263 = vrot.lane.b32.xlu1 %v2229_v8, %s3800_s17  ;;  %v2097_v55 = vshrl.u32 %v4886_v44, 16  ;;  %v2101_v16 = vrot.slane %v2099_v10, 1  ;;  %v2226_v27 = vsel %vm896_vm2, %v2224_v35, %v2225_v60  ;;  %v2233_v57 = vrot.slane %v4875_v20, 1 }
 0x220   : > { %v2119_v9 = vsel %vm644_vm4, %v2114_v4, %v2118_v63  ;;  %v1880_v36 = vor.u32 %v1878_v52, %v1877_v6  ;;  %v2106_v58 = vrot.slane %v2104_v3, 1  ;;  %v1950_v11 = vsel %vm3917_vm3, %v1877_v6, 0  ;;  %v2133_v6 = vpop.permute.xlu1 %2132 }
 0x221   : > { %2261 = vrot.lane.b32.xlu0 %v2226_v27, %s3800_s17  ;;  %v2102_v17 = vor.u32 %v2101_v16, %v2097_v55  ;;  %v1887_v59 = vor.u32 %v1885_v38, %v1884_v46  ;;  %v2234_v47 = vrot.slane %v1949_v33, 1  ;;  %v2230_v50 = vrot.slane %v4886_v44, 1 }
 0x222   : > { %v4910_v26 = vsel %vm3917_vm3, 0, %v1880_v36  ;;  %v2128_v51 = vshll.u32 %v1950_v11, 16  ;;  %v2231_v14 = vrot.slane %v1948_v39, 1  ;;  %v1951_v25 = vsel %vm3917_vm3, %v1884_v46, 0 }
 0x223   : > { %2160 = vrot.lane.b32.xlu1 %v2119_v9, %s3797_s15  ;;  %v2107_v42 = vsel %vm644_vm4, %v2102_v17, %v2106_v58  ;;  %v2123_v19 = vshll.u32 %v4910_v26, 16  ;;  %v4919_v15 = vsel %vm3917_vm3, 0, %v1887_v59  ;;  %v2235_v24 = vsel %vm896_vm2, %v2233_v57, %v2234_v47  ;;  %v3788_v59 = vld [vmem:[%s5388_s6 + $0x18] sm:$0xff]  }
 0x224   : > { %v2121_v12 = vshrl.u32 %v4910_v26, 16  ;;  %v2236_v33 = vrot.slane %v4910_v26, 1  ;;  %v2342_v0 = vshll.u32 %v4919_v15, 16  ;;  %v2232_v52 = vsel %vm896_vm2, %v2230_v50, %v2231_v14 }
 0x225   : > { %2158 = vrot.lane.b32.xlu0 %v2107_v42, %s3797_s15  ;;  %v2125_v53 = vrot.slane %v2123_v19, 1  ;;  %v2237_v32 = vrot.slane %v1950_v11, 1  ;;  %v2130_v5 = vrot.slane %v2128_v51, 1  ;;  %v2347_v29 = vshll.u32 %v1951_v25, 16 }
 0x226   : > { %v2344_v35 = vrot.slane %v2342_v0, 1  ;;  %v2355_v48 = vrot.slane %v4919_v15, 1  ;;  %v2340_v8 = vshrl.u32 %v4919_v15, 16  ;;  %v2356_v60 = vrot.slane %v1951_v25, 1 }
 0x227   : > { %2267 = vrot.lane.b32.xlu1 %v2235_v24, %s3800_s17  ;;  %v2126_v34 = vor.u32 %v2125_v53, %v2121_v12  ;;  %v2238_v39 = vsel %vm896_vm2, %v2236_v33, %v2237_v32  ;;  %v2349_v4 = vrot.slane %v2347_v29, 1  ;;  %v2272_v16 = vsel %vm1009_vm7, 0, %v2133_v6 }
 0x228   : > { %v2345_v10 = vor.u32 %v2344_v35, %v2340_v8  ;;  %v2357_v3 = vsel %vm896_vm2, %v2355_v48, %v2356_v60  ;;  %v2994_v17 = vsel %vm2992_vm10, %v2959_v28, 0 }
 0x229   : > { %2265 = vrot.lane.b32.xlu0 %v2232_v52, %s3800_s17  ;;  %v2131_v37 = vsel %vm644_vm4, %v2126_v34, %v2130_v5 }
 0x22a   : > { %v2350_v63 = vsel %vm644_vm4, %v2345_v10, %v2349_v4 }
 0x22b   : > { %2269 = vrot.lane.b32.xlu1 %v2238_v39, %s3800_s17 }
 0x22d   : > { %2162 = vrot.lane.b32.xlu0 %v2131_v37, %s3797_s15 }
 0x22f   : > { %2358 = vrot.lane.b32.xlu1 %v2357_v3, %s3800_s17 }
 0x231   : > { %2351 = vrot.lane.b32.xlu0 %v2350_v63, %s3797_s15 }
 0x246   : > { %v2242_v46 = vpop.permute.xlu0 %2241 }
 0x24f   : > { %v2137_v38 = vpop.permute.xlu1 %2136 }
 0x250   : > { %v2276_v58 = vsel %vm1009_vm7, %v4581_v23, %v2137_v38 }
 0x252   : > { %v2135_v55 = vpop.permute.xlu0 %2134 }
 0x253   : > { %v2274_v27 = vsel %vm1009_vm7, %v4559_v7, %v2135_v55  ;;  %v2240_v9 = vpop.permute.xlu1 %2239  ;;  %v2764_v7 = vsel %vm2410_vm9, %v4600_v43, 0 }
 0x254   : > { %v4945_v57 = vsel %vm2303_vm11, %v2272_v16, %v2240_v9  ;;  %v2307_v36 = vsel %vm2303_vm11, %v2274_v27, %v2242_v46 }
 0x255   : > { %3620 = vmatprep.mubr.msk.bf16.mxu1 %vm2377_vm12, %v2307_v36  ;;  %3656 = vmatprep.mubr.msk.bf16.mxu0 %vm2377_vm12, %v4945_v57 }
 0x256   : > { %v2244_v11 = vpop.permute.xlu0 %2243  ;;  %3657 = vmatmul.mubr.msk.bf16.vlgmr.msra.gmra.mxu0 %vm2377_vm12, %v2307_v36 }
 0x257   : > { %v4961_v28 = vsel %vm2303_vm11, %v2276_v58, %v2244_v11  ;;  %3725 = vmatpush3.bf16.msra.mxu0 %v2994_v17 }
 0x258   : > { %3621 = vmatmul.mubr.msk.bf16.vlgmr.msra.gmra.mxu1 %vm2377_vm12, %v4961_v28  ;;  %3660 = vmatprep.mubr.msk.bf16.mxu0 %vm2377_vm12, %v4961_v28 }
 0x259   : > { %3689 = vmatpush3.bf16.msra.mxu1 %v2764_v7 }
 0x25a   : > { %3690 = vmatprep.subr.bf16.mxu1 %v3788_v59 }
 0x25b   : > { %v2141_v23 = vpop.permute.xlu1 %2140 }
 0x25c   : > { %v2280_v50 = vsel %vm1009_vm7, %v4638_v1, %v2141_v23 }
 0x25d   : > { %3691 = vmatpush3.bf16.msra.mxu1 %v3788_v59 }
 0x25f   : > { %v2139_v42 = vpop.permute.xlu0 %2138  ;;  %v2248_v43 = vpop.permute.xlu1 %2247 }
 0x260   : > { %v2278_v47 = vsel %vm1009_vm7, %v4661_v2, %v2139_v42  ;;  %v4975_v24 = vsel %vm2303_vm11, %v2280_v50, %v2248_v43  ;;  %v5422_v43 = vld [vmem:[#allocation9_spill] sm:$0xff] }
 0x263   : > { %v2246_v19 = vpop.permute.xlu0 %2245 }
 0x264   : > { %v4972_v51 = vsel %vm2303_vm11, %v2278_v47, %v2246_v19 }
 0x265   : > { %3624 = vmatprep.mubr.msk.bf16.mxu1 %vm2377_vm12, %v4972_v51  ;;  %3661 = vmatmul.mubr.msk.bf16.gmra.mxu0 %vm2377_vm12, %v4972_v51 }
 0x266   : > { %3625 = vmatmul.mubr.msk.bf16.gmra.mxu1 %vm2377_vm12, %v4975_v24  ;;  %3664 = vmatprep.mubr.msk.bf16.mxu0 %vm2377_vm12, %v4975_v24 }
 0x269   : > { %v2145_v2 = vpop.permute.xlu1 %2144 }
 0x26a   : > { %v2284_v33 = vsel %vm1009_vm7, %v4703_v62, %v2145_v2 }
 0x26c   : > { %v2143_v1 = vpop.permute.xlu0 %2142 }
 0x26d   : > { %v2252_v12 = vpop.permute.xlu1 %2251  ;;  %v2282_v53 = vsel %vm1009_vm7, %v4724_v22, %v2143_v1 }
 0x26e   : > { %v4993_v0 = vsel %vm2303_vm11, %v2284_v33, %v2252_v12 }
 0x270   : > { %v2250_v14 = vpop.permute.xlu0 %2249 }
 0x271   : > { %v4990_v25 = vsel %vm2303_vm11, %v2282_v53, %v2250_v14 }
 0x272   : > { %3628 = vmatprep.mubr.msk.bf16.mxu1 %vm2377_vm12, %v4990_v25  ;;  %3665 = vmatmul.mubr.msk.bf16.gmra.mxu0 %vm2377_vm12, %v4990_v25 }
 0x273   : > { %3629 = vmatmul.mubr.msk.bf16.gmra.mxu1 %vm2377_vm12, %v4993_v0  ;;  %3668 = vmatprep.mubr.msk.bf16.mxu0 %vm2377_vm12, %v4993_v0 }
 0x276   : > { %v2149_v22 = vpop.permute.xlu1 %2148 }
 0x277   : > { %v2288_v5 = vsel %vm1009_vm7, %v4759_v31, %v2149_v22 }
 0x27a   : > { %v2147_v62 = vpop.permute.xlu0 %2146  ;;  %v2256_v34 = vpop.permute.xlu1 %2255 }
 0x27b   : > { %v2286_v52 = vsel %vm1009_vm7, %v4783_v56, %v2147_v62  ;;  %v5011_v29 = vsel %vm2303_vm11, %v2288_v5, %v2256_v34 }
 0x27e   : > { %v2254_v32 = vpop.permute.xlu0 %2253 }
 0x27f   : > { %v5008_v35 = vsel %vm2303_vm11, %v2286_v52, %v2254_v32 }
 0x280   : > { %3632 = vmatprep.mubr.msk.bf16.mxu1 %vm2377_vm12, %v5008_v35  ;;  %3669 = vmatmul.mubr.msk.bf16.gmra.mxu0 %vm2377_vm12, %v5008_v35 }
 0x281   : > { %3633 = vmatmul.mubr.msk.bf16.gmra.mxu1 %vm2377_vm12, %v5011_v29  ;;  %3672 = vmatprep.mubr.msk.bf16.mxu0 %vm2377_vm12, %v5011_v29 }
 0x284   : > { %v2153_v56 = vpop.permute.xlu1 %2152 }
 0x285   : > { %v2292_v8 = vsel %vm1009_vm7, %v4815_v45, %v2153_v56 }
 0x287   : > { %v2151_v31 = vpop.permute.xlu0 %2150 }
 0x288   : > { %v2260_v39 = vpop.permute.xlu1 %2259  ;;  %v2290_v37 = vsel %vm1009_vm7, %v4830_v13, %v2151_v31 }
 0x289   : > { %v2325_v10 = vsel %vm2303_vm11, %v2292_v8, %v2260_v39 }
 0x28b   : > { %v2258_v48 = vpop.permute.xlu0 %2257 }
 0x28c   : > { %v2323_v60 = vsel %vm2303_vm11, %v2290_v37, %v2258_v48 }
 0x28d   : > { %3636 = vmatprep.mubr.msk.bf16.mxu1 %vm2377_vm12, %v2323_v60  ;;  %3673 = vmatmul.mubr.msk.bf16.gmra.mxu0 %vm2377_vm12, %v2323_v60  ;;  %v2157_v3 = vpop.permute.xlu1 %2156 }
 0x28e   : > { %3637 = vmatmul.mubr.msk.bf16.gmra.mxu1 %vm2377_vm12, %v2325_v10  ;;  %3676 = vmatprep.mubr.msk.bf16.mxu0 %vm2377_vm12, %v2325_v10  ;;  %v2296_v45 = vsel %vm1009_vm7, %v4848_v61, %v2157_v3 }
 0x28f   : > { %v2155_v4 = vpop.permute.xlu0 %2154 }
 0x290   : > { %v2294_v13 = vsel %vm1009_vm7, %v4860_v41, %v2155_v4 }
 0x291   : > { %v2264_v63 = vpop.permute.xlu1 %2263 }
 0x292   : > { %v2329_v38 = vsel %vm2303_vm11, %v2296_v45, %v2264_v63 }
 0x293   : > { %v2262_v6 = vpop.permute.xlu0 %2261 }
 0x294   : > { %v2327_v46 = vsel %vm2303_vm11, %v2294_v13, %v2262_v6 }
 0x295   : > { %3640 = vmatprep.mubr.msk.bf16.mxu1 %vm2377_vm12, %v2327_v46  ;;  %3677 = vmatmul.mubr.msk.bf16.gmra.mxu0 %vm2377_vm12, %v2327_v46  ;;  %v2161_v55 = vpop.permute.xlu1 %2160 }
 0x296   : > { %3641 = vmatmul.mubr.msk.bf16.gmra.mxu1 %vm2377_vm12, %v2329_v38  ;;  %3680 = vmatprep.mubr.msk.bf16.mxu0 %vm2377_vm12, %v2329_v38  ;;  %v2300_v61 = vsel %vm1009_vm7, %v4875_v20, %v2161_v55 }
 0x297   : > { %v2159_v16 = vpop.permute.xlu0 %2158 }
 0x298   : > { %v2298_v41 = vsel %vm1009_vm7, %v4886_v44, %v2159_v16 }
 0x299   : > { %v2268_v27 = vpop.permute.xlu1 %2267 }
 0x29a   : > { %v2333_v17 = vsel %vm2303_vm11, %v2300_v61, %v2268_v27 }
 0x29b   : > { %v2266_v9 = vpop.permute.xlu0 %2265 }
 0x29c   : > { %v2331_v36 = vsel %vm2303_vm11, %v2298_v41, %v2266_v9 }
 0x29d   : > { %3644 = vmatprep.mubr.msk.bf16.mxu1 %vm2377_vm12, %v2331_v36  ;;  %3681 = vmatmul.mubr.msk.bf16.gmra.mxu0 %vm2377_vm12, %v2331_v36  ;;  %v2270_v58 = vpop.permute.xlu1 %2269 }
 0x29e   : > { %3645 = vmatmul.mubr.msk.bf16.gmra.mxu1 %vm2377_vm12, %v2333_v17  ;;  %3684 = vmatprep.mubr.msk.bf16.mxu0 %vm2377_vm12, %v2333_v17 }
 0x29f   : > { %v2163_v11 = vpop.permute.xlu0 %2162 }
 0x2a0   : > { %v2302_v44 = vsel %vm1009_vm7, %v4910_v26, %v2163_v11  ;;  %v5419_v26 = vld [vmem:[#allocation6_spill] sm:$0xff] }
 0x2a1   : > { %v2335_v7 = vsel %vm2303_vm11, %v2302_v44, %v2270_v58  ;;  %v2359_v59 = vpop.permute.xlu1 %2358 }
 0x2a2   : > { %3648 = vmatprep.mubr.msk.bf16.mxu1 %vm2377_vm12, %v2335_v7 }
 0x2a3   : > { %v2352_v20 = vpop.permute.xlu0 %2351 }
 0x2a4   : > { %v2361_v23 = vsel %vm1009_vm7, %v4919_v15, %v2352_v20  ;;  %v5420_v15 = vld [vmem:[#allocation7_spill] sm:$0xff] }
 0x2a5   : > { %3685 = vmatmul.mubr.msk.bf16.gmra.mxu0 %vm2377_vm12, %v2335_v7  ;;  %v2363_v42 = vsel %vm2303_vm11, %v2361_v23, %v2359_v59 }
 0x2a6   : > { %3649 = vmatmul.mubr.msk.bf16.gmra.mxu1 %vm2377_vm12, %v2363_v42  ;;  %3726 = vmatprep.mubr.msk.bf16.mxu0 %vm976_vm6, %v3925_v54  ;;  %v5414_v54 = vld [vmem:[#allocation11_spill] sm:$0xff] }
 0x2a7   : > { %3692 = vmatprep.mubr.msk.bf16.mxu1 %vm2377_vm12, %v4961_v28  ;;  %v5421_v28 = vld [vmem:[#allocation8_spill] sm:$0xff] }
 0x2ad   : > { %3727 = vmatmul.mubr.msk.bf16.vlgmr.msra.gmra.mxu0 %vm976_vm6, %v3907_v40  ;;  %v5413_v40 = vld [vmem:[#allocation10_spill] sm:$0xff] }
 0x2ae   : > { %3693 = vmatmul.mubr.msk.bf16.vlgmr.msra.gmra.mxu1 %vm2377_vm12, %v4972_v51  ;;  %3730 = vmatprep.mubr.msk.bf16.mxu0 %vm976_vm6, %v4030_v30  ;;  %v5416_v30 = vld [vmem:[#allocation2_spill] sm:$0xff] }
 0x2af   : > { %3696 = vmatprep.mubr.msk.bf16.mxu1 %vm2377_vm12, %v4975_v24 }
 0x2b5   : > { %3731 = vmatmul.mubr.msk.bf16.gmra.mxu0 %vm976_vm6, %v3964_v21  ;;  %v5415_v21 = vld [vmem:[#allocation3_spill] sm:$0xff] }
 0x2b6   : > { %3697 = vmatmul.mubr.msk.bf16.gmra.mxu1 %vm2377_vm12, %v4990_v25  ;;  %3734 = vmatprep.mubr.msk.bf16.mxu0 %vm976_vm6, %v4123_v49  ;;  %v5417_v49 = vld [vmem:[#allocation4_spill] sm:$0xff] }
 0x2b7   : > { %3700 = vmatprep.mubr.msk.bf16.mxu1 %vm2377_vm12, %v4993_v0 }
 0x2bd   : > { %3735 = vmatmul.mubr.msk.bf16.gmra.mxu0 %vm976_vm6, %v4138_v18  ;;  %v5418_v18 = vld [vmem:[#allocation5_spill] sm:$0xff] }
 0x2be   : > { %3701 = vmatmul.mubr.msk.bf16.gmra.mxu1 %vm2377_vm12, %v5008_v35  ;;  %3738 = vmatprep.mubr.msk.bf16.mxu0 %vm976_vm6, %v5413_v40 }
 0x2bf   : > { %3704 = vmatprep.mubr.msk.bf16.mxu1 %vm2377_vm12, %v5011_v29 }
 0x2c5   : > { %3739 = vmatmul.mubr.msk.bf16.gmra.mxu0 %vm976_vm6, %v5414_v54 }
 0x2c6   : > { %3705 = vmatmul.mubr.msk.bf16.gmra.mxu1 %vm2377_vm12, %v2323_v60  ;;  %3742 = vmatprep.mubr.msk.bf16.mxu0 %vm976_vm6, %v5415_v21 }
 0x2c7   : > { %3708 = vmatprep.mubr.msk.bf16.mxu1 %vm2377_vm12, %v2325_v10 }
 0x2cd   : > { %3743 = vmatmul.mubr.msk.bf16.gmra.mxu0 %vm976_vm6, %v5416_v30 }
 0x2ce   : > { %3709 = vmatmul.mubr.msk.bf16.gmra.mxu1 %vm2377_vm12, %v2327_v46  ;;  %3746 = vmatprep.mubr.msk.bf16.mxu0 %vm976_vm6, %v5417_v49 }
 0x2cf   : > { %3712 = vmatprep.mubr.msk.bf16.mxu1 %vm2377_vm12, %v2329_v38 }
 0x2d5   : > { %3747 = vmatmul.mubr.msk.bf16.gmra.mxu0 %vm976_vm6, %v5418_v18 }
 0x2d6   : > { %3713 = vmatmul.mubr.msk.bf16.gmra.mxu1 %vm2377_vm12, %v2331_v36  ;;  %3750 = vmatprep.mubr.msk.bf16.mxu0 %vm976_vm6, %v5419_v26 }
 0x2d7   : > { %3716 = vmatprep.mubr.msk.bf16.mxu1 %vm2377_vm12, %v2333_v17 }
 0x2dd   : > { %3751 = vmatmul.mubr.msk.bf16.gmra.mxu0 %vm976_vm6, %v5420_v15 }
 0x2de   : > { %3717 = vmatmul.mubr.msk.bf16.gmra.mxu1 %vm2377_vm12, %v2335_v7  ;;  %3754 = vmatprep.mubr.msk.bf16.mxu0 %vm976_vm6, %v5421_v28 }
 0x2df   : > { %3720 = vmatprep.mubr.msk.bf16.mxu1 %vm2377_vm12, %v2363_v42 }
 0x2e5   : > { %3755 = vmatmul.mubr.msk.bf16.gmra.mxu0 %vm976_vm6, %v5422_v43 }
 0x2e6   : > { %3721 = vmatmul.mubr.msk.bf16.gmra.mxu1 %vm2377_vm12, %v4945_v57 }
 0x316   : > { %v5116_v47 = vpop.f32.mrf.mxu0 }
 0x318   : > { %v5118_v19 = vpop.f32.mrf.mxu1  ;;  %v5120_v50 = vpop.f32.mrf.mxu0 }
 0x31a   : > { %v5122_v51 = vpop.f32.mrf.mxu1  ;;  %v5124_v24 = vpop.f32.mrf.mxu0 }
 0x31c   : > { %v5126_v2 = vpop.f32.mrf.mxu1  ;;  %v5128_v1 = vpop.f32.mrf.mxu0 }
 0x31e   : > { %v5130_v12 = vpop.f32.mrf.mxu1 }
 0x325   : > { %v5132_v53 = vpop.f32.mrf.mxu0 }
 0x326   : > { %v5134_v14 = vpop.f32.mrf.mxu1 }
 0x327   : > { %v5136_v57 = vpop.f32.mrf.mxu0 }
 0x328   : > { %v5138_v33 = vpop.f32.mrf.mxu1 }
 0x329   : > { %v5140_v25 = vpop.f32.mrf.mxu0 }
 0x32a   : > { %v5142_v0 = vpop.f32.mrf.mxu1 }
 0x32b   : > { %v5144_v22 = vpop.f32.mrf.mxu0 }
 0x32c   : > { %v5146_v62 = vpop.f32.mrf.mxu1 }
 0x332   : > { %v5148_v34 = vpop.f32.mrf.mxu0 }
 0x333   : > { %v5150_v52 = vpop.f32.mrf.mxu1 }
 0x334   : > { %v5152_v32 = vpop.f32.mrf.mxu0 }
 0x335   : > { %v5154_v5 = vpop.f32.mrf.mxu1 }
 0x336   : > { %v5156_v35 = vpop.f32.mrf.mxu0 }
 0x337   : > { %v5158_v29 = vpop.f32.mrf.mxu1 }
 0x338   : > { %v5160_v56 = vpop.f32.mrf.mxu0 }
 0x339   : > { %v5162_v31 = vpop.f32.mrf.mxu1 }
 0x340   : > { %v5164_v39 = vpop.f32.mrf.mxu0 }
 0x341   : > { %v5166_v37 = vpop.f32.mrf.mxu1 }
 0x342   : > { %v5168_v48 = vpop.f32.mrf.mxu0 }
 0x343   : > { %v5170_v8 = vpop.f32.mrf.mxu1 }
 0x344   : > { %v5172_v60 = vpop.f32.mrf.mxu0 }
 0x345   : > { %v5174_v10 = vpop.f32.mrf.mxu1 }
 0x346   : > { %v5176_v3 = vpop.f32.mrf.mxu0 }
 0x347   : > { %v5178_v4 = vpop.f32.mrf.mxu1 }
 0x34d   : > { %v5180_v63 = vpop.f32.mrf.mxu0 }
 0x34e   : > { %v5182_v13 = vpop.f32.mrf.mxu1 }
 0x34f   : > { %v5184_v6 = vpop.f32.mrf.mxu0 }
 0x350   : > { %v5186_v45 = vpop.f32.mrf.mxu1 }
 0x351   : > { %v5188_v46 = vpop.f32.mrf.mxu0 }
 0x352   : > { %v5190_v38 = vpop.f32.mrf.mxu1 }
 0x353   : > { %v5192_v55 = vpop.f32.mrf.mxu0 }
 0x354   : > { %v5194_v16 = vpop.f32.mrf.mxu1 }
 0x355   : > { %v5196_v27 = vpop.f32.mrf.mxu0 }
 0x356   : > { %v5198_v41 = vpop.f32.mrf.mxu1 }
 0x357   : > { %v5200_v9 = vpop.f32.mrf.mxu0 }
 0x358   : > { %v5202_v61 = vpop.f32.mrf.mxu1 }
 0x359   : > { %v5204_v36 = vpop.f32.mrf.mxu0 }
 0x35a   : > { %v5206_v17 = vpop.f32.mrf.mxu1 }
 0x35b   : > { %v5208_v58 = vpop.f32.mrf.mxu0 }
 0x35c   : > { %v5210_v11 = vpop.f32.mrf.mxu1 }
 0x35d   : > { %v5212_v44 = vpop.f32.mrf.mxu0 }
 0x35e   : > { %v5214_v7 = vpop.f32.mrf.mxu1 }
 0x35f   : > { %v5216_v20 = vpop.f32.mrf.mxu0 }
 0x360   : > { %v5218_v59 = vpop.f32.mrf.mxu1 }
 0x361   : > { %v5220_v23 = vpop.f32.mrf.mxu0 }
 0x362   : > { %5423 = vst [vmem:[#allocation10_spill] sm:$0xff] %v5220_v23  ;;  %v5222_v42 = vpop.f32.mrf.mxu1 }
 0x363   : > { %5424 = vst [vmem:[#allocation11_spill] sm:$0xff] %v5222_v42  ;;  %v5224_v40 = vpop.f32.mrf.mxu0  ;;  %v2648_v42 = vadd.f32 %v5132_v53, %v5134_v14  ;;  %v2651_v53 = vadd.f32 %v5140_v25, %v5142_v0  ;;  %v2664_v25 = vadd.f32 %v5148_v34, %v5150_v52  ;;  %v2667_v34 = vadd.f32 %v5156_v35, %v5158_v29 }
 0x364   : > { %5425 = vst [vmem:[#allocation3_spill] sm:$0xff] %v5224_v40  ;;  %v5226_v54 = vpop.f32.mrf.mxu1  ;;  %v2632_v40 = vadd.f32 %v5116_v47, %v5118_v19  ;;  %v2680_v35 = vadd.f32 %v5164_v39, %v5166_v37  ;;  %v2683_v39 = vadd.f32 %v5172_v60, %v5174_v10  ;;  %v2696_v60 = vadd.f32 %v5180_v63, %v5182_v13 }
 0x365   : > { %5426 = vst [vmem:[#allocation2_spill] sm:$0xff] %v5226_v54  ;;  %v5228_v21 = vpop.f32.mrf.mxu0  ;;  %v2699_v63 = vadd.f32 %v5188_v46, %v5190_v38  ;;  %v2712_v46 = vadd.f32 %v5196_v27, %v5198_v41  ;;  %v2715_v27 = vadd.f32 %v5204_v36, %v5206_v17  ;;  %v2728_v36 = vadd.f32 %v5212_v44, %v5214_v7 }
 0x366   : > { %5427 = vst [vmem:[#allocation4_spill] sm:$0xff] %v5228_v21  ;;  %v5230_v30 = vpop.f32.mrf.mxu1  ;;  %v2624_v21 = vadd.f32 %v5120_v50, %v5122_v51  ;;  %v2627_v50 = vadd.f32 %v5128_v1, %v5130_v12  ;;  %v2640_v1 = vadd.f32 %v5136_v57, %v5138_v33  ;;  %v2643_v57 = vadd.f32 %v5144_v22, %v5146_v62 }
 0x367   : > { %5428 = vst [vmem:[#allocation5_spill] sm:$0xff] %v5230_v30  ;;  %v5232_v49 = vpop.f32.mrf.mxu0  ;;  %v2656_v22 = vadd.f32 %v5152_v32, %v5154_v5  ;;  %v2659_v32 = vadd.f32 %v5160_v56, %v5162_v31  ;;  %v2672_v56 = vadd.f32 %v5168_v48, %v5170_v8  ;;  %v2675_v48 = vadd.f32 %v5176_v3, %v5178_v4 }
 0x368   : > { %5429 = vst [vmem:[#allocation6_spill] sm:$0xff] %v5232_v49  ;;  %v5234_v18 = vpop.f32.mrf.mxu1  ;;  %v2688_v3 = vadd.f32 %v5184_v6, %v5186_v45  ;;  %v2691_v6 = vadd.f32 %v5192_v55, %v5194_v16  ;;  %v2704_v55 = vadd.f32 %v5200_v9, %v5202_v61  ;;  %v2707_v9 = vadd.f32 %v5208_v58, %v5210_v11 }
 0x369   : > { %5430 = vst [vmem:[#allocation7_spill] sm:$0xff] %v5234_v18  ;;  %v5236_v26 = vpop.f32.mrf.mxu0  ;;  %v2720_v58 = vadd.f32 %v5216_v20, %v5218_v59 }
 0x36a   : > { %5431 = vst [vmem:[#allocation8_spill] sm:$0xff] %v5236_v26  ;;  %v5238_v15 = vpop.f32.mrf.mxu1 }
 0x36b   : > { %5432 = vst [vmem:[#allocation9_spill] sm:$0xff] %v5238_v15  ;;  %v5240_v28 = vpop.f32.mrf.mxu0 }
 0x36c   : > { %5433 = vst [vmem:[#allocation12_spill] sm:$0xff] %v5240_v28  ;;  %v5242_v43 = vpop.f32.mrf.mxu1 }
 0x36d   : > { %5434 = vst [vmem:[#allocation13_spill] sm:$0xff] %v5242_v43  ;;  %v3728_v54 = vpop.f32.mrf.mxu0  ;;  %v2635_v43 = vadd.f32 %v5124_v24, %v5126_v2 }
 0x36e   : > { %v3694_v23 = vpop.f32.mrf.mxu1 }
 0x36f   : > { %v2929_v30 = vadd.f32 %v3694_v23, %v2632_v40  ;;  %v3030_v49 = vpop.f32.mrf.mxu0 }
 0x370   : > { %v2800_v28 = vpop.f32.mrf.mxu1 }
 0x371   : > { %v3039_v47 = vadd.f32 %v3728_v54, %v2929_v30  ;;  %v2927_v19 = vadd.f32 %v2800_v28, %v2624_v21  ;;  %v3729_v26 = vpop.f32.mrf.mxu0 }
 0x372   : > { %v3695_v15 = vpop.f32.mrf.mxu1 }
 0x373   : > { %3159 = vst.msk [vmem:[%s5253_s25 + $0x10] sm:$0xff] %vm1009_vm7, %v3039_v47  ;;  %v3031_v51 = vadd.f32 %v3030_v49, %v2927_v19  ;;  %v2930_v23 = vadd.f32 %v3695_v15, %v2635_v43  ;;  %v3033_v40 = vpop.f32.mrf.mxu0 }
 0x374   : > { %v2803_v18 = vpop.f32.mrf.mxu1 }
 0x375   : > { %3157 = vst.msk [vmem:[%s5253_s25] sm:$0xff] %vm1009_vm7, %v3031_v51  ;;  %v3042_v24 = vadd.f32 %v3729_v26, %v2930_v23  ;;  %v2928_v2 = vadd.f32 %v2803_v18, %v2627_v50  ;;  %v3732_v54 = vpop.f32.mrf.mxu0 }
 0x376   : > { %v3698_v21 = vpop.f32.mrf.mxu1 }
 0x377   : > { %3160 = vst.msk [vmem:[%s5253_s25 + $0x18] sm:$0xff] %vm1009_vm7, %v3042_v24  ;;  %v3034_v12 = vadd.f32 %v3033_v40, %v2928_v2  ;;  %v2933_v30 = vadd.f32 %v3698_v21, %v2648_v42  ;;  %v3046_v49 = vpop.f32.mrf.mxu0 }
 0x378   : > { %v2816_v15 = vpop.f32.mrf.mxu1 }
 0x379   : > { %3158 = vst.msk [vmem:[%s5253_s25 + $0x8] sm:$0xff] %vm1009_vm7, %v3034_v12  ;;  %v3055_v14 = vadd.f32 %v3732_v54, %v2933_v30  ;;  %v2931_v18 = vadd.f32 %v2816_v15, %v2640_v1  ;;  %v3733_v26 = vpop.f32.mrf.mxu0 }
 0x37a   : > { %v3699_v28 = vpop.f32.mrf.mxu1 }
 0x37b   : > { %3163 = vst.msk [vmem:[%s5253_s25 + $0x30] sm:$0xff] %vm1009_vm7, %v3055_v14  ;;  %v3047_v33 = vadd.f32 %v3046_v49, %v2931_v18  ;;  %v2934_v42 = vadd.f32 %v3699_v28, %v2651_v53  ;;  %v3049_v43 = vpop.f32.mrf.mxu0 }
 0x37c   : > { %v2819_v47 = vpop.f32.mrf.mxu1 }
 0x37d   : > { %3161 = vst.msk [vmem:[%s5253_s25 + $0x20] sm:$0xff] %vm1009_vm7, %v3047_v33  ;;  %v3058_v0 = vadd.f32 %v3733_v26, %v2934_v42  ;;  %v2932_v19 = vadd.f32 %v2819_v47, %v2643_v57  ;;  %v3736_v50 = vpop.f32.mrf.mxu0 }
 0x37e   : > { %v3702_v51 = vpop.f32.mrf.mxu1 }
 0x37f   : > { %3164 = vst.msk [vmem:[%s5253_s25 + $0x38] sm:$0xff] %vm1009_vm7, %v3058_v0  ;;  %v3050_v62 = vadd.f32 %v3049_v43, %v2932_v19  ;;  %v2937_v23 = vadd.f32 %v3702_v51, %v2664_v25  ;;  %v3062_v40 = vpop.f32.mrf.mxu0 }
 0x380   : > { %v2832_v24 = vpop.f32.mrf.mxu1 }
 0x381   : > { %3162 = vst.msk [vmem:[%s5253_s25 + $0x28] sm:$0xff] %vm1009_vm7, %v3050_v62  ;;  %v3071_v52 = vadd.f32 %v3736_v50, %v2937_v23  ;;  %v2935_v2 = vadd.f32 %v2832_v24, %v2656_v22  ;;  %v3737_v54 = vpop.f32.mrf.mxu0 }
 0x382   : > { %v3703_v21 = vpop.f32.mrf.mxu1 }
 0x383   : > { %3167 = vst.msk [vmem:[%s5253_s25 + $0x50] sm:$0xff] %vm1009_vm7, %v3071_v52  ;;  %v3063_v5 = vadd.f32 %v3062_v40, %v2935_v2  ;;  %v2938_v1 = vadd.f32 %v3703_v21, %v2667_v34  ;;  %v3065_v12 = vpop.f32.mrf.mxu0 }
 0x384   : > { %v2835_v30 = vpop.f32.mrf.mxu1 }
 0x385   : > { %3165 = vst.msk [vmem:[%s5253_s25 + $0x40] sm:$0xff] %vm1009_vm7, %v3063_v5  ;;  %v3074_v29 = vadd.f32 %v3737_v54, %v2938_v1  ;;  %v2936_v49 = vadd.f32 %v2835_v30, %v2659_v32  ;;  %v3740_v15 = vpop.f32.mrf.mxu0 }
 0x386   : > { %v3706_v53 = vpop.f32.mrf.mxu1 }
 0x387   : > { %3168 = vst.msk [vmem:[%s5253_s25 + $0x58] sm:$0xff] %vm1009_vm7, %v3074_v29  ;;  %v3066_v31 = vadd.f32 %v3065_v12, %v2936_v49  ;;  %v2941_v14 = vadd.f32 %v3706_v53, %v2680_v35  ;;  %v3078_v18 = vpop.f32.mrf.mxu0 }
 0x388   : > { %v2848_v26 = vpop.f32.mrf.mxu1 }
 0x389   : > { %3166 = vst.msk [vmem:[%s5253_s25 + $0x48] sm:$0xff] %vm1009_vm7, %v3066_v31  ;;  %v3087_v37 = vadd.f32 %v3740_v15, %v2941_v14  ;;  %v2939_v28 = vadd.f32 %v2848_v26, %v2672_v56  ;;  %v3741_v57 = vpop.f32.mrf.mxu0 }
 0x38a   : > { %v3707_v33 = vpop.f32.mrf.mxu1 }
 0x38b   : > { %3171 = vst.msk [vmem:[%s5253_s25 + $0x70] sm:$0xff] %vm1009_vm7, %v3087_v37  ;;  %v3079_v8 = vadd.f32 %v3078_v18, %v2939_v28  ;;  %v2942_v42 = vadd.f32 %v3707_v33, %v2683_v39  ;;  %v3081_v43 = vpop.f32.mrf.mxu0  ;;  %v5435_v39 = vld [vmem:[#allocation11_spill] sm:$0xff]  ;;  %v5436_v37 = vld [vmem:[#allocation10_spill] sm:$0xff] }
 0x38c   : > { %v2851_v47 = vpop.f32.mrf.mxu1  ;;  %v2731_v44 = vadd.f32 %v5436_v37, %v5435_v39 }
 0x38d   : > { %3169 = vst.msk [vmem:[%s5253_s25 + $0x60] sm:$0xff] %vm1009_vm7, %v3079_v8  ;;  %v3090_v10 = vadd.f32 %v3741_v57, %v2942_v42  ;;  %v2940_v25 = vadd.f32 %v2851_v47, %v2675_v48  ;;  %v3744_v0 = vpop.f32.mrf.mxu0  ;;  %v5437_v48 = vld [vmem:[#allocation2_spill] sm:$0xff]  ;;  %v5438_v8 = vld [vmem:[#allocation3_spill] sm:$0xff] }
 0x38e   : > { %v3710_v19 = vpop.f32.mrf.mxu1  ;;  %v2723_v20 = vadd.f32 %v5438_v8, %v5437_v48 }
 0x38f   : > { %3172 = vst.msk [vmem:[%s5253_s25 + $0x78] sm:$0xff] %vm1009_vm7, %v3090_v10  ;;  %v3082_v4 = vadd.f32 %v3081_v43, %v2940_v25  ;;  %v2945_v50 = vadd.f32 %v3710_v19, %v2696_v60  ;;  %v3094_v51 = vpop.f32.mrf.mxu0  ;;  %v5439_v60 = vld [vmem:[#allocation5_spill] sm:$0xff]  ;;  %v5440_v10 = vld [vmem:[#allocation4_spill] sm:$0xff] }
 0x390   : > { %v2864_v22 = vpop.f32.mrf.mxu1  ;;  %v2744_v25 = vadd.f32 %v5440_v10, %v5439_v60 }
 0x391   : > { %3170 = vst.msk [vmem:[%s5253_s25 + $0x68] sm:$0xff] %vm1009_vm7, %v3082_v4  ;;  %v3103_v13 = vadd.f32 %v3744_v0, %v2945_v50  ;;  %v2943_v62 = vadd.f32 %v2864_v22, %v2688_v3  ;;  %v3745_v23 = vpop.f32.mrf.mxu0  ;;  %v5441_v50 = vld [vmem:[#allocation7_spill] sm:$0xff] }
 0x392   : > { %v3711_v40 = vpop.f32.mrf.mxu1 }
 0x393   : > { %3175 = vst.msk [vmem:[%s5253_s25 + $0x90] sm:$0xff] %vm1009_vm7, %v3103_v13  ;;  %v3095_v45 = vadd.f32 %v3094_v51, %v2943_v62  ;;  %v2946_v24 = vadd.f32 %v3711_v40, %v2699_v63  ;;  %v3097_v34 = vpop.f32.mrf.mxu0  ;;  %v5442_v51 = vld [vmem:[#allocation6_spill] sm:$0xff]  ;;  %v5443_v40 = vld [vmem:[#allocation9_spill] sm:$0xff] }
 0x394   : > { %v2867_v52 = vpop.f32.mrf.mxu1  ;;  %v2736_v22 = vadd.f32 %v5442_v51, %v5441_v50 }
 0x395   : > { %3173 = vst.msk [vmem:[%s5253_s25 + $0x80] sm:$0xff] %vm1009_vm7, %v3095_v45  ;;  %v3106_v38 = vadd.f32 %v3745_v23, %v2946_v24  ;;  %v2944_v2 = vadd.f32 %v2867_v52, %v2691_v6  ;;  %v3748_v54 = vpop.f32.mrf.mxu0  ;;  %v5444_v6 = vld [vmem:[#allocation8_spill] sm:$0xff] }
 0x396   : > { %v3714_v21 = vpop.f32.mrf.mxu1  ;;  %v2747_v45 = vadd.f32 %v5444_v6, %v5443_v40 }
 0x397   : > { %3176 = vst.msk [vmem:[%s5253_s25 + $0x98] sm:$0xff] %vm1009_vm7, %v3106_v38  ;;  %v3098_v16 = vadd.f32 %v3097_v34, %v2944_v2  ;;  %v2949_v32 = vadd.f32 %v3714_v21, %v2712_v46  ;;  %v3110_v5 = vpop.f32.mrf.mxu0  ;;  %v5445_v38 = vld [vmem:[#allocation13_spill] sm:$0xff]  ;;  %v5446_v2 = vld [vmem:[#allocation12_spill] sm:$0xff] }
 0x398   : > { %v2880_v1 = vpop.f32.mrf.mxu1 }
 0x399   : > { %3174 = vst.msk [vmem:[%s5253_s25 + $0x88] sm:$0xff] %vm1009_vm7, %v3098_v16  ;;  %v3119_v41 = vadd.f32 %v3748_v54, %v2949_v32  ;;  %v2947_v12 = vadd.f32 %v2880_v1, %v2704_v55  ;;  %v3749_v30 = vpop.f32.mrf.mxu0  ;;  %v2739_v54 = vadd.f32 %v5446_v2, %v5445_v38 }
 0x39a   : > { %v3715_v35 = vpop.f32.mrf.mxu1 }
 0x39b   : > { %3179 = vst.msk [vmem:[%s5253_s25 + $0xb0] sm:$0xff] %vm1009_vm7, %v3119_v41  ;;  %v3111_v61 = vadd.f32 %v3110_v5, %v2947_v12  ;;  %v2950_v29 = vadd.f32 %v3715_v35, %v2715_v27  ;;  %v3113_v49 = vpop.f32.mrf.mxu0 }
 0x39c   : > { %v2883_v15 = vpop.f32.mrf.mxu1 }
 0x39d   : > { %3177 = vst.msk [vmem:[%s5253_s25 + $0xa0] sm:$0xff] %vm1009_vm7, %v3111_v61  ;;  %v3122_v17 = vadd.f32 %v3749_v30, %v2950_v29  ;;  %v2948_v53 = vadd.f32 %v2883_v15, %v2707_v9  ;;  %v3752_v56 = vpop.f32.mrf.mxu0 }
 0x39e   : > { %v3718_v31 = vpop.f32.mrf.mxu1 }
 0x39f   : > { %3180 = vst.msk [vmem:[%s5253_s25 + $0xb8] sm:$0xff] %vm1009_vm7, %v3122_v17  ;;  %v3114_v11 = vadd.f32 %v3113_v49, %v2948_v53  ;;  %v2953_v14 = vadd.f32 %v3718_v31, %v2728_v36  ;;  %v3126_v18 = vpop.f32.mrf.mxu0 }
 0x3a0   : > { %v2896_v26 = vpop.f32.mrf.mxu1 }
 0x3a1   : > { %3178 = vst.msk [vmem:[%s5253_s25 + $0xa8] sm:$0xff] %vm1009_vm7, %v3114_v11  ;;  %v3135_v7 = vadd.f32 %v3752_v56, %v2953_v14  ;;  %v2951_v28 = vadd.f32 %v2896_v26, %v2720_v58  ;;  %v3753_v57 = vpop.f32.mrf.mxu0 }
 0x3a2   : > { %v3719_v33 = vpop.f32.mrf.mxu1 }
 0x3a3   : > { %3183 = vst.msk [vmem:[%s5253_s25 + $0xd0] sm:$0xff] %vm1009_vm7, %v3135_v7  ;;  %v3127_v59 = vadd.f32 %v3126_v18, %v2951_v28  ;;  %v2954_v42 = vadd.f32 %v3719_v33, %v2731_v44  ;;  %v3129_v43 = vpop.f32.mrf.mxu0 }
 0x3a4   : > { %v2899_v47 = vpop.f32.mrf.mxu1 }
 0x3a5   : > { %3181 = vst.msk [vmem:[%s5253_s25 + $0xc0] sm:$0xff] %vm1009_vm7, %v3127_v59  ;;  %v3138_v0 = vadd.f32 %v3753_v57, %v2954_v42  ;;  %v2952_v19 = vadd.f32 %v2899_v47, %v2723_v20  ;;  %v3756_v3 = vpop.f32.mrf.mxu0 }
 0x3a6   : > { %v3722_v4 = vpop.f32.mrf.mxu1 }
 0x3a7   : > { %3184 = vst.msk [vmem:[%s5253_s25 + $0xd8] sm:$0xff] %vm1009_vm7, %v3138_v0  ;;  %v3130_v63 = vadd.f32 %v3129_v43, %v2952_v19  ;;  %v2957_v13 = vadd.f32 %v3722_v4, %v2744_v25  ;;  %v3142_v62 = vpop.f32.mrf.mxu0 }
 0x3a8   : > { %v2912_v23 = vpop.f32.mrf.mxu1 }
 0x3a9   : > { %3182 = vst.msk [vmem:[%s5253_s25 + $0xc8] sm:$0xff] %vm1009_vm7, %v3130_v63  ;;  %v3151_v24 = vadd.f32 %v3756_v3, %v2957_v13  ;;  %v2955_v34 = vadd.f32 %v2912_v23, %v2736_v22  ;;  %v3757_v52 = vpop.f32.mrf.mxu0 }
 0x3aa   : > { %v3723_v46 = vpop.f32.mrf.mxu1 }
 0x3ab   : > { %3187 = vst.msk [vmem:[%s5253_s25 + $0xf0] sm:$0xff] %vm1009_vm7, %v3151_v24  ;;  %v3143_v21 = vadd.f32 %v3142_v62, %v2955_v34  ;;  %v2958_v55 = vadd.f32 %v3723_v46, %v2747_v45  ;;  %v3145_v1 = vpop.f32.mrf.mxu0 }
 0x3ac   : > { %v2915_v16 = vpop.f32.mrf.mxu1 }
 0x3ad   : > { %3185 = vst.msk [vmem:[%s5253_s25 + $0xe0] sm:$0xff] %vm1009_vm7, %v3143_v21  ;;  %v3154_v32 = vadd.f32 %v3757_v52, %v2958_v55  ;;  %v2956_v5 = vadd.f32 %v2915_v16, %v2739_v54 }
 0x3af   : > { %3188 = vst.msk [vmem:[%s5253_s25 + $0xf8] sm:$0xff] %vm1009_vm7, %v3154_v32  ;;  %v3146_v27 = vadd.f32 %v3145_v1, %v2956_v5 }
 0x3b1   : > { %3186 = vst.msk [vmem:[%s5253_s25 + $0xe8] sm:$0xff] %vm1009_vm7, %v3146_v27 }
 0x3b2 PF: > { %s18_s27 = sadd.s32 1, %s3795_s27  }
 0x3b3   : > { %p15_p4 = scmp.ge.s32.totalorder %s18_s27, 4  }
 0x3b5   :  { %17 = sbr.rel (!%p15_p4) target bundleno = 1 (0x1), region = 86 }

</bundles_post_ra>
